<compile_context>
chip_gen: v7x
topology: tpu7x:2x2x1
jax: 0.10.0
libtpu: 0.0.40
codegen_flags: <defaults>
</compile_context>

<pallas_src>
import jax
import jax.numpy as jnp
from jax import lax
from jax.experimental import pallas as pl
from jax.experimental.pallas import tpu as pltpu


def _encoder_lstm_kernel(emb_ref, wih0_ref, wihr_ref, whh_ref, b_ref,
                         hid_out_ref, cell_out_ref,
                         x_slab, gx_sc):
    """One grid step == one LSTM layer.

    emb_ref : (seq, batch, emb_dim)   embedded tokens (layer-0 input), VMEM resident
    wih0_ref: (emb_dim, 4*hid)        layer-0 input weights, transposed
    wihr_ref: (1, hid, 4*hid)         this layer's input weights (dummy zeros at l=0)
    whh_ref : (1, hid, 4*hid)         this layer's recurrent weights, transposed
    b_ref   : (1, 1, 4*hid)           this layer's combined bias (b_ih + b_hh)
    hid_out : (1, batch, hid)         final h of this layer
    cell_out: (1, batch, hid)         final c of this layer
    x_slab  : VMEM (seq, batch, hid)  inter-layer activations (stay on-chip)
    gx_sc   : VMEM (seq, batch, 4*hid) hoisted input projection for all timesteps
    """
    l = pl.program_id(0)
    seq, batch, emb_dim = emb_ref.shape
    hid = whh_ref.shape[1]

    bias = b_ref[0]                                    # (1, 4*hid)

    # ---- Hoisted input projection: one big MXU matmul over all timesteps ----
    @pl.when(l == 0)
    def _():
        x2d = emb_ref[...].reshape(seq * batch, emb_dim)
        g = jnp.dot(x2d, wih0_ref[...],
                    preferred_element_type=jnp.float32) + bias
        gx_sc[...] = g.reshape(seq, batch, 4 * hid)

    @pl.when(l > 0)
    def _():
        x2d = x_slab[...].reshape(seq * batch, hid)    # previous layer's outputs
        g = jnp.dot(x2d, wihr_ref[0],
                    preferred_element_type=jnp.float32) + bias
        gx_sc[...] = g.reshape(seq, batch, 4 * hid)

    whh = whh_ref[0]                                   # (hid, 4*hid)

    # ---- Sequential recurrence: single MXU matmul per timestep --------------
    def step(t, carry):
        h_prev, c_prev = carry
        gates = gx_sc[t] + jnp.dot(h_prev, whh,
                                   preferred_element_type=jnp.float32)
        # PyTorch gate order [i, f, g, o]
        i_g = jax.nn.sigmoid(gates[:, 0 * hid:1 * hid])
        f_g = jax.nn.sigmoid(gates[:, 1 * hid:2 * hid])
        g_g = jnp.tanh(gates[:, 2 * hid:3 * hid])
        o_g = jax.nn.sigmoid(gates[:, 3 * hid:4 * hid])
        c_new = f_g * c_prev + i_g * g_g
        h_new = o_g * jnp.tanh(c_new)
        x_slab[t] = h_new                              # next layer's input (VMEM only)
        return (h_new, c_new)

    zeros = jnp.zeros((batch, hid), jnp.float32)
    h_fin, c_fin = lax.fori_loop(0, seq, step, (zeros, zeros), unroll=True)

    # Final states written ONCE per layer.
    hid_out_ref[0] = h_fin.astype(hid_out_ref.dtype)
    cell_out_ref[0] = c_fin.astype(cell_out_ref.dtype)


def encoder_forward(params, src):
    """src: (seq_len, batch) int32 token ids -> (hidden, cell), each (n_layers, batch, hid)."""
    emb_table = params["embedding"]
    layers = params["lstm"]
    n_layers = len(layers)
    hid = layers[0]["w_hh"].shape[1]
    emb_dim = emb_table.shape[1]

    # Embedding lookup (gather) — plain-JAX glue. Dropout (eval mode) = identity.
    embedded = jnp.take(emb_table, src, axis=0).astype(jnp.float32)  # (seq, batch, emb)
    seq, batch, _ = embedded.shape

    # Pre-transposed / stacked weights.
    wih0_t = jnp.transpose(layers[0]["w_ih"]).astype(jnp.float32)    # (emb_dim, 4*hid)
    wih_rest = jnp.stack(
        [jnp.zeros((hid, 4 * hid), jnp.float32)]                     # dummy for layer 0
        + [jnp.transpose(lp["w_ih"]).astype(jnp.float32) for lp in layers[1:]],
        axis=0)                                                      # (n_layers, hid, 4*hid)
    whh_t = jnp.stack(
        [jnp.transpose(lp["w_hh"]).astype(jnp.float32) for lp in layers],
        axis=0)                                                      # (n_layers, hid, 4*hid)
    b_all = jnp.stack(
        [(lp["b_ih"] + lp["b_hh"]).reshape(1, 4 * hid).astype(jnp.float32)
         for lp in layers],
        axis=0)                                                      # (n_layers, 1, 4*hid)

    grid_spec = pltpu.PrefetchScalarGridSpec(
        num_scalar_prefetch=0,
        grid=(n_layers,),
        in_specs=[
            pl.BlockSpec((seq, batch, emb_dim), lambda l: (0, 0, 0)),   # embedded (resident)
            pl.BlockSpec((emb_dim, 4 * hid), lambda l: (0, 0)),         # layer-0 W_ih^T
            pl.BlockSpec((1, hid, 4 * hid), lambda l: (l, 0, 0)),       # per-layer W_ih^T
            pl.BlockSpec((1, hid, 4 * hid), lambda l: (l, 0, 0)),       # per-layer W_hh^T
            pl.BlockSpec((1, 1, 4 * hid), lambda l: (l, 0, 0)),         # per-layer bias
        ],
        out_specs=[
            pl.BlockSpec((1, batch, hid), lambda l: (l, 0, 0)),         # hidden
            pl.BlockSpec((1, batch, hid), lambda l: (l, 0, 0)),         # cell
        ],
        scratch_shapes=[
            pltpu.VMEM((seq, batch, hid), jnp.float32),      # inter-layer activations
            pltpu.VMEM((seq, batch, 4 * hid), jnp.float32),  # hoisted input projection
        ],
    )

    hidden, cell = pl.pallas_call(
        _encoder_lstm_kernel,
        out_shape=(jax.ShapeDtypeStruct((n_layers, batch, hid), jnp.float32),
                   jax.ShapeDtypeStruct((n_layers, batch, hid), jnp.float32)),
        grid_spec=grid_spec,
        compiler_params=pltpu.CompilerParams(
            dimension_semantics=("arbitrary",)),  # layers are sequentially dependent
    )(embedded, wih0_t, wih_rest, whh_t, b_all)
    return hidden, cell


encoder_forward_jit = jax.jit(encoder_forward)


def encoder_forward_ref(params, src):
    """Pure-JAX reference (same math, no Pallas) for correctness checking."""
    x = jnp.take(params["embedding"], src, axis=0).astype(jnp.float32)
    hs, cs = [], []
    for lp in params["lstm"]:
        wih = lp["w_ih"].astype(jnp.float32)
        whh = lp["w_hh"].astype(jnp.float32)
        b = (lp["b_ih"] + lp["b_hh"]).astype(jnp.float32)
        hid = whh.shape[1]
        seq, batch, _ = x.shape
        h = jnp.zeros((batch, hid), jnp.float32)
        c = jnp.zeros((batch, hid), jnp.float32)
        outs = []
        for t in range(seq):
            gates = (jnp.dot(x[t], wih.T, precision=lax.Precision.HIGHEST)
                     + jnp.dot(h, whh.T, precision=lax.Precision.HIGHEST) + b)
            i_g = jax.nn.sigmoid(gates[:, 0 * hid:1 * hid])
            f_g = jax.nn.sigmoid(gates[:, 1 * hid:2 * hid])
            g_g = jnp.tanh(gates[:, 2 * hid:3 * hid])
            o_g = jax.nn.sigmoid(gates[:, 3 * hid:4 * hid])
            c = f_g * c + i_g * g_g
            h = o_g * jnp.tanh(c)
            outs.append(h)
        x = jnp.stack(outs, axis=0)
        hs.append(h)
        cs.append(c)
    return jnp.stack(hs, axis=0), jnp.stack(cs, axis=0)


def init_encoder_params(key, input_dim, emb_dim, hid_dim, n_layers):
    """Embedding ~ N(0,1) (nn.Embedding default); LSTM ~ U(-1/sqrt(hid), 1/sqrt(hid))."""
    keys = jax.random.split(key, 1 + 4 * n_layers)
    params = {"embedding": jax.random.normal(keys[0], (input_dim, emb_dim),
                                             dtype=jnp.float32)}
    bound = 1.0 / jnp.sqrt(hid_dim)
    layers = []
    for layer in range(n_layers):
        in_dim = emb_dim if layer == 0 else hid_dim
        k0, k1, k2, k3 = keys[1 + 4 * layer: 5 + 4 * layer]
        layers.append({
            "w_ih": jax.random.uniform(k0, (4 * hid_dim, in_dim),
                                       minval=-bound, maxval=bound, dtype=jnp.float32),
            "w_hh": jax.random.uniform(k1, (4 * hid_dim, hid_dim),
                                       minval=-bound, maxval=bound, dtype=jnp.float32),
            "b_ih": jax.random.uniform(k2, (4 * hid_dim,),
                                       minval=-bound, maxval=bound, dtype=jnp.float32),
            "b_hh": jax.random.uniform(k3, (4 * hid_dim,),
                                       minval=-bound, maxval=bound, dtype=jnp.float32),
        })
    params["lstm"] = layers
    return params


if __name__ == "__main__":
    INPUT_DIM = 50    # vocab size
    EMB_DIM = 32
    HID_DIM = 32
    N_LAYERS = 2
    SEQ_LEN = 8
    BATCH = 2

    key = jax.random.PRNGKey(0)
    pkey, skey = jax.random.split(key)

    params = init_encoder_params(pkey, INPUT_DIM, EMB_DIM, HID_DIM, N_LAYERS)
    src = jax.random.randint(skey, (SEQ_LEN, BATCH), 0, INPUT_DIM, dtype=jnp.int32)

    hidden, cell = encoder_forward_jit(params, src)
    jax.block_until_ready((hidden, cell))

    assert hidden.shape == (N_LAYERS, BATCH, HID_DIM)
    assert cell.shape == (N_LAYERS, BATCH, HID_DIM)

    # Correctness check against a pure-JAX reference.
    h_ref, c_ref = encoder_forward_ref(params, src)
    jax.block_until_ready((h_ref, c_ref))
    assert jnp.allclose(hidden, h_ref, atol=2e-2, rtol=2e-2)
    assert jnp.allclose(cell, c_ref, atol=2e-2, rtol=2e-2)

    print("KERNEL_OK")
</pallas_src>

<mosaic_0001>
module attributes {stable_mosaic.version = 11 : i64} {
  func.func @_encoder_lstm_kernel(%arg0: i32, %arg1: memref<8x2x32xf32, #tpu.memory_space<vmem>>, %arg2: memref<32x128xf32, #tpu.memory_space<vmem>>, %arg3: memref<1x32x128xf32, #tpu.memory_space<vmem>>, %arg4: memref<1x32x128xf32, #tpu.memory_space<vmem>>, %arg5: memref<1x1x128xf32, #tpu.memory_space<vmem>>, %arg6: memref<1x2x32xf32, #tpu.memory_space<vmem>>, %arg7: memref<1x2x32xf32, #tpu.memory_space<vmem>>, %arg8: memref<8x2x32xf32, #tpu.memory_space<vmem>>, %arg9: memref<8x2x128xf32, #tpu.memory_space<vmem>>) attributes {dimension_semantics = [#tpu.dimension_semantics<arbitrary>], iteration_bounds = array<i64: 2>, scalar_prefetch = 0 : i64, scratch_operands = 2 : i64, tpu.core_type = #tpu.core_type<tc>, window_params = [{pipeline_mode = #tpu.pipeline_mode<synchronous>, transform_indices = @transform_0, window_bounds = array<i64: 8, 2, 32>}, {pipeline_mode = #tpu.pipeline_mode<synchronous>, transform_indices = @transform_1, window_bounds = array<i64: 32, 128>}, {transform_indices = @transform_2, window_bounds = array<i64: 1, 32, 128>}, {transform_indices = @transform_3, window_bounds = array<i64: 1, 32, 128>}, {transform_indices = @transform_4, window_bounds = array<i64: 1, 1, 128>}, {transform_indices = @transform_5, window_bounds = array<i64: 1, 2, 32>}, {transform_indices = @transform_6, window_bounds = array<i64: 1, 2, 32>}]} {
    %c0 = arith.constant 0 : index
    %c0_0 = arith.constant 0 : index
    %c0_1 = arith.constant 0 : index
    %0 = vector.load %arg5[%c0, %c0_0, %c0_1] : memref<1x1x128xf32, #tpu.memory_space<vmem>>, vector<1x1x128xf32>
    %1 = vector.shape_cast %0 : vector<1x1x128xf32> to vector<1x128xf32>
    %c0_i32 = arith.constant 0 : i32
    %2 = arith.cmpi eq, %arg0, %c0_i32 : i32
    %3 = arith.extui %2 : i1 to i32
    %c0_i32_2 = arith.constant 0 : i32
    %4 = arith.cmpi ne, %3, %c0_i32_2 : i32
    scf.if %4 {
      %c0_79 = arith.constant 0 : index
      %c0_80 = arith.constant 0 : index
      %c0_81 = arith.constant 0 : index
      %289 = vector.load %arg1[%c0_79, %c0_80, %c0_81] : memref<8x2x32xf32, #tpu.memory_space<vmem>>, vector<8x2x32xf32>
      %290 = vector.shape_cast %289 : vector<8x2x32xf32> to vector<16x32xf32>
      %c0_82 = arith.constant 0 : index
      %c0_83 = arith.constant 0 : index
      %291 = vector.load %arg2[%c0_82, %c0_83] : memref<32x128xf32, #tpu.memory_space<vmem>>, vector<32x128xf32>
      %cst_84 = arith.constant dense<0.000000e+00> : vector<16x128xf32>
      %292 = tpu.matmul %290, %291, %cst_84 {dimension_numbers = #tpu.dot_dimension_numbers<[1], [0], [0], [1], [0, 0, 1, 1], [], []>} : vector<16x32xf32>, vector<32x128xf32>, vector<16x128xf32> -> vector<16x128xf32>
      %293 = vector.broadcast %1 : vector<1x128xf32> to vector<16x128xf32>
      %294 = arith.addf %292, %293 : vector<16x128xf32>
      %295 = vector.shape_cast %294 : vector<16x128xf32> to vector<8x2x128xf32>
      %c0_85 = arith.constant 0 : index
      %c0_86 = arith.constant 0 : index
      %c0_87 = arith.constant 0 : index
      %296 = vector.load %arg9[%c0_85, %c0_86, %c0_87] : memref<8x2x128xf32, #tpu.memory_space<vmem>>, vector<8x2x128xf32>
      tpu.vector_store %arg9[%c0_85, %c0_86, %c0_87], %295 {strides = array<i32>} : memref<8x2x128xf32, #tpu.memory_space<vmem>>, vector<8x2x128xf32>,
    } else {
    }
    %c0_i32_3 = arith.constant 0 : i32
    %5 = arith.cmpi sgt, %arg0, %c0_i32_3 : i32
    %6 = arith.extui %5 : i1 to i32
    %c0_i32_4 = arith.constant 0 : i32
    %7 = arith.cmpi ne, %6, %c0_i32_4 : i32
    scf.if %7 {
      %c0_79 = arith.constant 0 : index
      %c0_80 = arith.constant 0 : index
      %c0_81 = arith.constant 0 : index
      %289 = vector.load %arg8[%c0_79, %c0_80, %c0_81] : memref<8x2x32xf32, #tpu.memory_space<vmem>>, vector<8x2x32xf32>
      %290 = vector.shape_cast %289 : vector<8x2x32xf32> to vector<16x32xf32>
      %c0_82 = arith.constant 0 : index
      %c0_83 = arith.constant 0 : index
      %c0_84 = arith.constant 0 : index
      %291 = vector.load %arg3[%c0_82, %c0_83, %c0_84] : memref<1x32x128xf32, #tpu.memory_space<vmem>>, vector<1x32x128xf32>
      %292 = vector.shape_cast %291 : vector<1x32x128xf32> to vector<32x128xf32>
      %cst_85 = arith.constant dense<0.000000e+00> : vector<16x128xf32>
      %293 = tpu.matmul %290, %292, %cst_85 {dimension_numbers = #tpu.dot_dimension_numbers<[1], [0], [0], [1], [0, 0, 1, 1], [], []>} : vector<16x32xf32>, vector<32x128xf32>, vector<16x128xf32> -> vector<16x128xf32>
      %294 = vector.broadcast %1 : vector<1x128xf32> to vector<16x128xf32>
      %295 = arith.addf %293, %294 : vector<16x128xf32>
      %296 = vector.shape_cast %295 : vector<16x128xf32> to vector<8x2x128xf32>
      %c0_86 = arith.constant 0 : index
      %c0_87 = arith.constant 0 : index
      %c0_88 = arith.constant 0 : index
      %297 = vector.load %arg9[%c0_86, %c0_87, %c0_88] : memref<8x2x128xf32, #tpu.memory_space<vmem>>, vector<8x2x128xf32>
      tpu.vector_store %arg9[%c0_86, %c0_87, %c0_88], %296 {strides = array<i32>} : memref<8x2x128xf32, #tpu.memory_space<vmem>>, vector<8x2x128xf32>,
    } else {
    }
    %c0_5 = arith.constant 0 : index
    %c0_6 = arith.constant 0 : index
    %c0_7 = arith.constant 0 : index
    %8 = vector.load %arg4[%c0_5, %c0_6, %c0_7] : memref<1x32x128xf32, #tpu.memory_space<vmem>>, vector<1x32x128xf32>
    %9 = vector.shape_cast %8 : vector<1x32x128xf32> to vector<32x128xf32>
    %cst = arith.constant 0.000000e+00 : f32
    %10 = vector.broadcast %cst : f32 to vector<2x32xf32>
    %c0_i32_8 = arith.constant 0 : i32
    %11 = arith.index_cast %c0_i32_8 : i32 to index
    %c0_9 = arith.constant 0 : index
    %c0_10 = arith.constant 0 : index
    %12 = vector.load %arg9[%11, %c0_9, %c0_10] : memref<8x2x128xf32, #tpu.memory_space<vmem>>, vector<1x2x128xf32>
    %13 = vector.shape_cast %12 : vector<1x2x128xf32> to vector<2x128xf32>
    %cst_11 = arith.constant dense<0.000000e+00> : vector<2x128xf32>
    %14 = tpu.matmul %10, %9, %cst_11 {dimension_numbers = #tpu.dot_dimension_numbers<[1], [0], [0], [1], [0, 0, 1, 1], [], []>} : vector<2x32xf32>, vector<32x128xf32>, vector<2x128xf32> -> vector<2x128xf32>
    %15 = arith.addf %13, %14 : vector<2x128xf32>
    %16 = vector.extract_strided_slice %15 {offsets = [0, 0], sizes = [2, 32], strides = [1, 1]} : vector<2x128xf32> to vector<2x32xf32>
    %17 = arith.negf %16 : vector<2x32xf32>
    %18 = math.exp %17 : vector<2x32xf32>
    %cst_12 = arith.constant 1.000000e+00 : f32
    %19 = vector.broadcast %cst_12 : f32 to vector<2x32xf32>
    %20 = arith.addf %19, %18 : vector<2x32xf32>
    %21 = arith.divf %19, %20 : vector<2x32xf32>
    %22 = vector.extract_strided_slice %15 {offsets = [0, 32], sizes = [2, 32], strides = [1, 1]} : vector<2x128xf32> to vector<2x32xf32>
    %23 = arith.negf %22 : vector<2x32xf32>
    %24 = math.exp %23 : vector<2x32xf32>
    %cst_13 = arith.constant 1.000000e+00 : f32
    %25 = vector.broadcast %cst_13 : f32 to vector<2x32xf32>
    %26 = arith.addf %25, %24 : vector<2x32xf32>
    %27 = arith.divf %25, %26 : vector<2x32xf32>
    %28 = vector.extract_strided_slice %15 {offsets = [0, 64], sizes = [2, 32], strides = [1, 1]} : vector<2x128xf32> to vector<2x32xf32>
    %29 = math.tanh %28 : vector<2x32xf32>
    %30 = vector.extract_strided_slice %15 {offsets = [0, 96], sizes = [2, 32], strides = [1, 1]} : vector<2x128xf32> to vector<2x32xf32>
    %31 = arith.negf %30 : vector<2x32xf32>
    %32 = math.exp %31 : vector<2x32xf32>
    %cst_14 = arith.constant 1.000000e+00 : f32
    %33 = vector.broadcast %cst_14 : f32 to vector<2x32xf32>
    %34 = arith.addf %33, %32 : vector<2x32xf32>
    %35 = arith.divf %33, %34 : vector<2x32xf32>
    %36 = arith.mulf %27, %10 : vector<2x32xf32>
    %37 = arith.mulf %21, %29 : vector<2x32xf32>
    %38 = arith.addf %36, %37 : vector<2x32xf32>
    %39 = math.tanh %38 : vector<2x32xf32>
    %40 = arith.mulf %35, %39 : vector<2x32xf32>
    %41 = arith.index_cast %c0_i32_8 : i32 to index
    %c0_15 = arith.constant 0 : index
    %c0_16 = arith.constant 0 : index
    %42 = vector.load %arg8[%41, %c0_15, %c0_16] : memref<8x2x32xf32, #tpu.memory_space<vmem>>, vector<1x2x32xf32>
    %43 = vector.shape_cast %42 : vector<1x2x32xf32> to vector<2x32xf32>
    %44 = vector.shape_cast %40 : vector<2x32xf32> to vector<1x2x32xf32>
    tpu.vector_store %arg8[%41, %c0_15, %c0_16], %44 {strides = array<i32>} : memref<8x2x32xf32, #tpu.memory_space<vmem>>, vector<1x2x32xf32>,
    %c1_i32 = arith.constant 1 : i32
    %45 = arith.index_cast %c1_i32 : i32 to index
    %c0_17 = arith.constant 0 : index
    %c0_18 = arith.constant 0 : index
    %46 = vector.load %arg9[%45, %c0_17, %c0_18] : memref<8x2x128xf32, #tpu.memory_space<vmem>>, vector<1x2x128xf32>
    %47 = vector.shape_cast %46 : vector<1x2x128xf32> to vector<2x128xf32>
    %cst_19 = arith.constant dense<0.000000e+00> : vector<2x128xf32>
    %48 = tpu.matmul %40, %9, %cst_19 {dimension_numbers = #tpu.dot_dimension_numbers<[1], [0], [0], [1], [0, 0, 1, 1], [], []>} : vector<2x32xf32>, vector<32x128xf32>, vector<2x128xf32> -> vector<2x128xf32>
    %49 = arith.addf %47, %48 : vector<2x128xf32>
    %50 = vector.extract_strided_slice %49 {offsets = [0, 0], sizes = [2, 32], strides = [1, 1]} : vector<2x128xf32> to vector<2x32xf32>
    %51 = arith.negf %50 : vector<2x32xf32>
    %52 = math.exp %51 : vector<2x32xf32>
    %cst_20 = arith.constant 1.000000e+00 : f32
    %53 = vector.broadcast %cst_20 : f32 to vector<2x32xf32>
    %54 = arith.addf %53, %52 : vector<2x32xf32>
    %55 = arith.divf %53, %54 : vector<2x32xf32>
    %56 = vector.extract_strided_slice %49 {offsets = [0, 32], sizes = [2, 32], strides = [1, 1]} : vector<2x128xf32> to vector<2x32xf32>
    %57 = arith.negf %56 : vector<2x32xf32>
    %58 = math.exp %57 : vector<2x32xf32>
    %cst_21 = arith.constant 1.000000e+00 : f32
    %59 = vector.broadcast %cst_21 : f32 to vector<2x32xf32>
    %60 = arith.addf %59, %58 : vector<2x32xf32>
    %61 = arith.divf %59, %60 : vector<2x32xf32>
    %62 = vector.extract_strided_slice %49 {offsets = [0, 64], sizes = [2, 32], strides = [1, 1]} : vector<2x128xf32> to vector<2x32xf32>
    %63 = math.tanh %62 : vector<2x32xf32>
    %64 = vector.extract_strided_slice %49 {offsets = [0, 96], sizes = [2, 32], strides = [1, 1]} : vector<2x128xf32> to vector<2x32xf32>
    %65 = arith.negf %64 : vector<2x32xf32>
    %66 = math.exp %65 : vector<2x32xf32>
    %cst_22 = arith.constant 1.000000e+00 : f32
    %67 = vector.broadcast %cst_22 : f32 to vector<2x32xf32>
    %68 = arith.addf %67, %66 : vector<2x32xf32>
    %69 = arith.divf %67, %68 : vector<2x32xf32>
    %70 = arith.mulf %61, %38 : vector<2x32xf32>
    %71 = arith.mulf %55, %63 : vector<2x32xf32>
    %72 = arith.addf %70, %71 : vector<2x32xf32>
    %73 = math.tanh %72 : vector<2x32xf32>
    %74 = arith.mulf %69, %73 : vector<2x32xf32>
    %75 = arith.index_cast %c1_i32 : i32 to index
    %c0_23 = arith.constant 0 : index
    %c0_24 = arith.constant 0 : index
    %76 = vector.load %arg8[%75, %c0_23, %c0_24] : memref<8x2x32xf32, #tpu.memory_space<vmem>>, vector<1x2x32xf32>
    %77 = vector.shape_cast %76 : vector<1x2x32xf32> to vector<2x32xf32>
    %78 = vector.shape_cast %74 : vector<2x32xf32> to vector<1x2x32xf32>
    tpu.vector_store %arg8[%75, %c0_23, %c0_24], %78 {strides = array<i32>} : memref<8x2x32xf32, #tpu.memory_space<vmem>>, vector<1x2x32xf32>,
    %c2_i32 = arith.constant 2 : i32
    %79 = arith.index_cast %c2_i32 : i32 to index
    %c0_25 = arith.constant 0 : index
    %c0_26 = arith.constant 0 : index
    %80 = vector.load %arg9[%79, %c0_25, %c0_26] : memref<8x2x128xf32, #tpu.memory_space<vmem>>, vector<1x2x128xf32>
    %81 = vector.shape_cast %80 : vector<1x2x128xf32> to vector<2x128xf32>
    %cst_27 = arith.constant dense<0.000000e+00> : vector<2x128xf32>
    %82 = tpu.matmul %74, %9, %cst_27 {dimension_numbers = #tpu.dot_dimension_numbers<[1], [0], [0], [1], [0, 0, 1, 1], [], []>} : vector<2x32xf32>, vector<32x128xf32>, vector<2x128xf32> -> vector<2x128xf32>
    %83 = arith.addf %81, %82 : vector<2x128xf32>
    %84 = vector.extract_strided_slice %83 {offsets = [0, 0], sizes = [2, 32], strides = [1, 1]} : vector<2x128xf32> to vector<2x32xf32>
    %85 = arith.negf %84 : vector<2x32xf32>
    %86 = math.exp %85 : vector<2x32xf32>
    %cst_28 = arith.constant 1.000000e+00 : f32
    %87 = vector.broadcast %cst_28 : f32 to vector<2x32xf32>
    %88 = arith.addf %87, %86 : vector<2x32xf32>
    %89 = arith.divf %87, %88 : vector<2x32xf32>
    %90 = vector.extract_strided_slice %83 {offsets = [0, 32], sizes = [2, 32], strides = [1, 1]} : vector<2x128xf32> to vector<2x32xf32>
    %91 = arith.negf %90 : vector<2x32xf32>
    %92 = math.exp %91 : vector<2x32xf32>
    %cst_29 = arith.constant 1.000000e+00 : f32
    %93 = vector.broadcast %cst_29 : f32 to vector<2x32xf32>
    %94 = arith.addf %93, %92 : vector<2x32xf32>
    %95 = arith.divf %93, %94 : vector<2x32xf32>
    %96 = vector.extract_strided_slice %83 {offsets = [0, 64], sizes = [2, 32], strides = [1, 1]} : vector<2x128xf32> to vector<2x32xf32>
    %97 = math.tanh %96 : vector<2x32xf32>
    %98 = vector.extract_strided_slice %83 {offsets = [0, 96], sizes = [2, 32], strides = [1, 1]} : vector<2x128xf32> to vector<2x32xf32>
    %99 = arith.negf %98 : vector<2x32xf32>
    %100 = math.exp %99 : vector<2x32xf32>
    %cst_30 = arith.constant 1.000000e+00 : f32
    %101 = vector.broadcast %cst_30 : f32 to vector<2x32xf32>
    %102 = arith.addf %101, %100 : vector<2x32xf32>
    %103 = arith.divf %101, %102 : vector<2x32xf32>
    %104 = arith.mulf %95, %72 : vector<2x32xf32>
    %105 = arith.mulf %89, %97 : vector<2x32xf32>
    %106 = arith.addf %104, %105 : vector<2x32xf32>
    %107 = math.tanh %106 : vector<2x32xf32>
    %108 = arith.mulf %103, %107 : vector<2x32xf32>
    %109 = arith.index_cast %c2_i32 : i32 to index
    %c0_31 = arith.constant 0 : index
    %c0_32 = arith.constant 0 : index
    %110 = vector.load %arg8[%109, %c0_31, %c0_32] : memref<8x2x32xf32, #tpu.memory_space<vmem>>, vector<1x2x32xf32>
    %111 = vector.shape_cast %110 : vector<1x2x32xf32> to vector<2x32xf32>
    %112 = vector.shape_cast %108 : vector<2x32xf32> to vector<1x2x32xf32>
    tpu.vector_store %arg8[%109, %c0_31, %c0_32], %112 {strides = array<i32>} : memref<8x2x32xf32, #tpu.memory_space<vmem>>, vector<1x2x32xf32>,
    %c3_i32 = arith.constant 3 : i32
    %113 = arith.index_cast %c3_i32 : i32 to index
    %c0_33 = arith.constant 0 : index
    %c0_34 = arith.constant 0 : index
    %114 = vector.load %arg9[%113, %c0_33, %c0_34] : memref<8x2x128xf32, #tpu.memory_space<vmem>>, vector<1x2x128xf32>
    %115 = vector.shape_cast %114 : vector<1x2x128xf32> to vector<2x128xf32>
    %cst_35 = arith.constant dense<0.000000e+00> : vector<2x128xf32>
    %116 = tpu.matmul %108, %9, %cst_35 {dimension_numbers = #tpu.dot_dimension_numbers<[1], [0], [0], [1], [0, 0, 1, 1], [], []>} : vector<2x32xf32>, vector<32x128xf32>, vector<2x128xf32> -> vector<2x128xf32>
    %117 = arith.addf %115, %116 : vector<2x128xf32>
    %118 = vector.extract_strided_slice %117 {offsets = [0, 0], sizes = [2, 32], strides = [1, 1]} : vector<2x128xf32> to vector<2x32xf32>
    %119 = arith.negf %118 : vector<2x32xf32>
    %120 = math.exp %119 : vector<2x32xf32>
    %cst_36 = arith.constant 1.000000e+00 : f32
    %121 = vector.broadcast %cst_36 : f32 to vector<2x32xf32>
    %122 = arith.addf %121, %120 : vector<2x32xf32>
    %123 = arith.divf %121, %122 : vector<2x32xf32>
    %124 = vector.extract_strided_slice %117 {offsets = [0, 32], sizes = [2, 32], strides = [1, 1]} : vector<2x128xf32> to vector<2x32xf32>
    %125 = arith.negf %124 : vector<2x32xf32>
    %126 = math.exp %125 : vector<2x32xf32>
    %cst_37 = arith.constant 1.000000e+00 : f32
    %127 = vector.broadcast %cst_37 : f32 to vector<2x32xf32>
    %128 = arith.addf %127, %126 : vector<2x32xf32>
    %129 = arith.divf %127, %128 : vector<2x32xf32>
    %130 = vector.extract_strided_slice %117 {offsets = [0, 64], sizes = [2, 32], strides = [1, 1]} : vector<2x128xf32> to vector<2x32xf32>
    %131 = math.tanh %130 : vector<2x32xf32>
    %132 = vector.extract_strided_slice %117 {offsets = [0, 96], sizes = [2, 32], strides = [1, 1]} : vector<2x128xf32> to vector<2x32xf32>
    %133 = arith.negf %132 : vector<2x32xf32>
    %134 = math.exp %133 : vector<2x32xf32>
    %cst_38 = arith.constant 1.000000e+00 : f32
    %135 = vector.broadcast %cst_38 : f32 to vector<2x32xf32>
    %136 = arith.addf %135, %134 : vector<2x32xf32>
    %137 = arith.divf %135, %136 : vector<2x32xf32>
    %138 = arith.mulf %129, %106 : vector<2x32xf32>
    %139 = arith.mulf %123, %131 : vector<2x32xf32>
    %140 = arith.addf %138, %139 : vector<2x32xf32>
    %141 = math.tanh %140 : vector<2x32xf32>
    %142 = arith.mulf %137, %141 : vector<2x32xf32>
    %143 = arith.index_cast %c3_i32 : i32 to index
    %c0_39 = arith.constant 0 : index
    %c0_40 = arith.constant 0 : index
    %144 = vector.load %arg8[%143, %c0_39, %c0_40] : memref<8x2x32xf32, #tpu.memory_space<vmem>>, vector<1x2x32xf32>
    %145 = vector.shape_cast %144 : vector<1x2x32xf32> to vector<2x32xf32>
    %146 = vector.shape_cast %142 : vector<2x32xf32> to vector<1x2x32xf32>
    tpu.vector_store %arg8[%143, %c0_39, %c0_40], %146 {strides = array<i32>} : memref<8x2x32xf32, #tpu.memory_space<vmem>>, vector<1x2x32xf32>,
    %c4_i32 = arith.constant 4 : i32
    %147 = arith.index_cast %c4_i32 : i32 to index
    %c0_41 = arith.constant 0 : index
    %c0_42 = arith.constant 0 : index
    %148 = vector.load %arg9[%147, %c0_41, %c0_42] : memref<8x2x128xf32, #tpu.memory_space<vmem>>, vector<1x2x128xf32>
    %149 = vector.shape_cast %148 : vector<1x2x128xf32> to vector<2x128xf32>
    %cst_43 = arith.constant dense<0.000000e+00> : vector<2x128xf32>
    %150 = tpu.matmul %142, %9, %cst_43 {dimension_numbers = #tpu.dot_dimension_numbers<[1], [0], [0], [1], [0, 0, 1, 1], [], []>} : vector<2x32xf32>, vector<32x128xf32>, vector<2x128xf32> -> vector<2x128xf32>
    %151 = arith.addf %149, %150 : vector<2x128xf32>
    %152 = vector.extract_strided_slice %151 {offsets = [0, 0], sizes = [2, 32], strides = [1, 1]} : vector<2x128xf32> to vector<2x32xf32>
    %153 = arith.negf %152 : vector<2x32xf32>
    %154 = math.exp %153 : vector<2x32xf32>
    %cst_44 = arith.constant 1.000000e+00 : f32
    %155 = vector.broadcast %cst_44 : f32 to vector<2x32xf32>
    %156 = arith.addf %155, %154 : vector<2x32xf32>
    %157 = arith.divf %155, %156 : vector<2x32xf32>
    %158 = vector.extract_strided_slice %151 {offsets = [0, 32], sizes = [2, 32], strides = [1, 1]} : vector<2x128xf32> to vector<2x32xf32>
    %159 = arith.negf %158 : vector<2x32xf32>
    %160 = math.exp %159 : vector<2x32xf32>
    %cst_45 = arith.constant 1.000000e+00 : f32
    %161 = vector.broadcast %cst_45 : f32 to vector<2x32xf32>
    %162 = arith.addf %161, %160 : vector<2x32xf32>
    %163 = arith.divf %161, %162 : vector<2x32xf32>
    %164 = vector.extract_strided_slice %151 {offsets = [0, 64], sizes = [2, 32], strides = [1, 1]} : vector<2x128xf32> to vector<2x32xf32>
    %165 = math.tanh %164 : vector<2x32xf32>
    %166 = vector.extract_strided_slice %151 {offsets = [0, 96], sizes = [2, 32], strides = [1, 1]} : vector<2x128xf32> to vector<2x32xf32>
    %167 = arith.negf %166 : vector<2x32xf32>
    %168 = math.exp %167 : vector<2x32xf32>
    %cst_46 = arith.constant 1.000000e+00 : f32
    %169 = vector.broadcast %cst_46 : f32 to vector<2x32xf32>
    %170 = arith.addf %169, %168 : vector<2x32xf32>
    %171 = arith.divf %169, %170 : vector<2x32xf32>
    %172 = arith.mulf %163, %140 : vector<2x32xf32>
    %173 = arith.mulf %157, %165 : vector<2x32xf32>
    %174 = arith.addf %172, %173 : vector<2x32xf32>
    %175 = math.tanh %174 : vector<2x32xf32>
    %176 = arith.mulf %171, %175 : vector<2x32xf32>
    %177 = arith.index_cast %c4_i32 : i32 to index
    %c0_47 = arith.constant 0 : index
    %c0_48 = arith.constant 0 : index
    %178 = vector.load %arg8[%177, %c0_47, %c0_48] : memref<8x2x32xf32, #tpu.memory_space<vmem>>, vector<1x2x32xf32>
    %179 = vector.shape_cast %178 : vector<1x2x32xf32> to vector<2x32xf32>
    %180 = vector.shape_cast %176 : vector<2x32xf32> to vector<1x2x32xf32>
    tpu.vector_store %arg8[%177, %c0_47, %c0_48], %180 {strides = array<i32>} : memref<8x2x32xf32, #tpu.memory_space<vmem>>, vector<1x2x32xf32>,
    %c5_i32 = arith.constant 5 : i32
    %181 = arith.index_cast %c5_i32 : i32 to index
    %c0_49 = arith.constant 0 : index
    %c0_50 = arith.constant 0 : index
    %182 = vector.load %arg9[%181, %c0_49, %c0_50] : memref<8x2x128xf32, #tpu.memory_space<vmem>>, vector<1x2x128xf32>
    %183 = vector.shape_cast %182 : vector<1x2x128xf32> to vector<2x128xf32>
    %cst_51 = arith.constant dense<0.000000e+00> : vector<2x128xf32>
    %184 = tpu.matmul %176, %9, %cst_51 {dimension_numbers = #tpu.dot_dimension_numbers<[1], [0], [0], [1], [0, 0, 1, 1], [], []>} : vector<2x32xf32>, vector<32x128xf32>, vector<2x128xf32> -> vector<2x128xf32>
    %185 = arith.addf %183, %184 : vector<2x128xf32>
    %186 = vector.extract_strided_slice %185 {offsets = [0, 0], sizes = [2, 32], strides = [1, 1]} : vector<2x128xf32> to vector<2x32xf32>
    %187 = arith.negf %186 : vector<2x32xf32>
    %188 = math.exp %187 : vector<2x32xf32>
    %cst_52 = arith.constant 1.000000e+00 : f32
    %189 = vector.broadcast %cst_52 : f32 to vector<2x32xf32>
    %190 = arith.addf %189, %188 : vector<2x32xf32>
    %191 = arith.divf %189, %190 : vector<2x32xf32>
    %192 = vector.extract_strided_slice %185 {offsets = [0, 32], sizes = [2, 32], strides = [1, 1]} : vector<2x128xf32> to vector<2x32xf32>
    %193 = arith.negf %192 : vector<2x32xf32>
    %194 = math.exp %193 : vector<2x32xf32>
    %cst_53 = arith.constant 1.000000e+00 : f32
    %195 = vector.broadcast %cst_53 : f32 to vector<2x32xf32>
    %196 = arith.addf %195, %194 : vector<2x32xf32>
    %197 = arith.divf %195, %196 : vector<2x32xf32>
    %198 = vector.extract_strided_slice %185 {offsets = [0, 64], sizes = [2, 32], strides = [1, 1]} : vector<2x128xf32> to vector<2x32xf32>
    %199 = math.tanh %198 : vector<2x32xf32>
    %200 = vector.extract_strided_slice %185 {offsets = [0, 96], sizes = [2, 32], strides = [1, 1]} : vector<2x128xf32> to vector<2x32xf32>
    %201 = arith.negf %200 : vector<2x32xf32>
    %202 = math.exp %201 : vector<2x32xf32>
    %cst_54 = arith.constant 1.000000e+00 : f32
    %203 = vector.broadcast %cst_54 : f32 to vector<2x32xf32>
    %204 = arith.addf %203, %202 : vector<2x32xf32>
    %205 = arith.divf %203, %204 : vector<2x32xf32>
    %206 = arith.mulf %197, %174 : vector<2x32xf32>
    %207 = arith.mulf %191, %199 : vector<2x32xf32>
    %208 = arith.addf %206, %207 : vector<2x32xf32>
    %209 = math.tanh %208 : vector<2x32xf32>
    %210 = arith.mulf %205, %209 : vector<2x32xf32>
    %211 = arith.index_cast %c5_i32 : i32 to index
    %c0_55 = arith.constant 0 : index
    %c0_56 = arith.constant 0 : index
    %212 = vector.load %arg8[%211, %c0_55, %c0_56] : memref<8x2x32xf32, #tpu.memory_space<vmem>>, vector<1x2x32xf32>
    %213 = vector.shape_cast %212 : vector<1x2x32xf32> to vector<2x32xf32>
    %214 = vector.shape_cast %210 : vector<2x32xf32> to vector<1x2x32xf32>
    tpu.vector_store %arg8[%211, %c0_55, %c0_56], %214 {strides = array<i32>} : memref<8x2x32xf32, #tpu.memory_space<vmem>>, vector<1x2x32xf32>,
    %c6_i32 = arith.constant 6 : i32
    %215 = arith.index_cast %c6_i32 : i32 to index
    %c0_57 = arith.constant 0 : index
    %c0_58 = arith.constant 0 : index
    %216 = vector.load %arg9[%215, %c0_57, %c0_58] : memref<8x2x128xf32, #tpu.memory_space<vmem>>, vector<1x2x128xf32>
    %217 = vector.shape_cast %216 : vector<1x2x128xf32> to vector<2x128xf32>
    %cst_59 = arith.constant dense<0.000000e+00> : vector<2x128xf32>
    %218 = tpu.matmul %210, %9, %cst_59 {dimension_numbers = #tpu.dot_dimension_numbers<[1], [0], [0], [1], [0, 0, 1, 1], [], []>} : vector<2x32xf32>, vector<32x128xf32>, vector<2x128xf32> -> vector<2x128xf32>
    %219 = arith.addf %217, %218 : vector<2x128xf32>
    %220 = vector.extract_strided_slice %219 {offsets = [0, 0], sizes = [2, 32], strides = [1, 1]} : vector<2x128xf32> to vector<2x32xf32>
    %221 = arith.negf %220 : vector<2x32xf32>
    %222 = math.exp %221 : vector<2x32xf32>
    %cst_60 = arith.constant 1.000000e+00 : f32
    %223 = vector.broadcast %cst_60 : f32 to vector<2x32xf32>
    %224 = arith.addf %223, %222 : vector<2x32xf32>
    %225 = arith.divf %223, %224 : vector<2x32xf32>
    %226 = vector.extract_strided_slice %219 {offsets = [0, 32], sizes = [2, 32], strides = [1, 1]} : vector<2x128xf32> to vector<2x32xf32>
    %227 = arith.negf %226 : vector<2x32xf32>
    %228 = math.exp %227 : vector<2x32xf32>
    %cst_61 = arith.constant 1.000000e+00 : f32
    %229 = vector.broadcast %cst_61 : f32 to vector<2x32xf32>
    %230 = arith.addf %229, %228 : vector<2x32xf32>
    %231 = arith.divf %229, %230 : vector<2x32xf32>
    %232 = vector.extract_strided_slice %219 {offsets = [0, 64], sizes = [2, 32], strides = [1, 1]} : vector<2x128xf32> to vector<2x32xf32>
    %233 = math.tanh %232 : vector<2x32xf32>
    %234 = vector.extract_strided_slice %219 {offsets = [0, 96], sizes = [2, 32], strides = [1, 1]} : vector<2x128xf32> to vector<2x32xf32>
    %235 = arith.negf %234 : vector<2x32xf32>
    %236 = math.exp %235 : vector<2x32xf32>
    %cst_62 = arith.constant 1.000000e+00 : f32
    %237 = vector.broadcast %cst_62 : f32 to vector<2x32xf32>
    %238 = arith.addf %237, %236 : vector<2x32xf32>
    %239 = arith.divf %237, %238 : vector<2x32xf32>
    %240 = arith.mulf %231, %208 : vector<2x32xf32>
    %241 = arith.mulf %225, %233 : vector<2x32xf32>
    %242 = arith.addf %240, %241 : vector<2x32xf32>
    %243 = math.tanh %242 : vector<2x32xf32>
    %244 = arith.mulf %239, %243 : vector<2x32xf32>
    %245 = arith.index_cast %c6_i32 : i32 to index
    %c0_63 = arith.constant 0 : index
    %c0_64 = arith.constant 0 : index
    %246 = vector.load %arg8[%245, %c0_63, %c0_64] : memref<8x2x32xf32, #tpu.memory_space<vmem>>, vector<1x2x32xf32>
    %247 = vector.shape_cast %246 : vector<1x2x32xf32> to vector<2x32xf32>
    %248 = vector.shape_cast %244 : vector<2x32xf32> to vector<1x2x32xf32>
    tpu.vector_store %arg8[%245, %c0_63, %c0_64], %248 {strides = array<i32>} : memref<8x2x32xf32, #tpu.memory_space<vmem>>, vector<1x2x32xf32>,
    %c7_i32 = arith.constant 7 : i32
    %249 = arith.index_cast %c7_i32 : i32 to index
    %c0_65 = arith.constant 0 : index
    %c0_66 = arith.constant 0 : index
    %250 = vector.load %arg9[%249, %c0_65, %c0_66] : memref<8x2x128xf32, #tpu.memory_space<vmem>>, vector<1x2x128xf32>
    %251 = vector.shape_cast %250 : vector<1x2x128xf32> to vector<2x128xf32>
    %cst_67 = arith.constant dense<0.000000e+00> : vector<2x128xf32>
    %252 = tpu.matmul %244, %9, %cst_67 {dimension_numbers = #tpu.dot_dimension_numbers<[1], [0], [0], [1], [0, 0, 1, 1], [], []>} : vector<2x32xf32>, vector<32x128xf32>, vector<2x128xf32> -> vector<2x128xf32>
    %253 = arith.addf %251, %252 : vector<2x128xf32>
    %254 = vector.extract_strided_slice %253 {offsets = [0, 0], sizes = [2, 32], strides = [1, 1]} : vector<2x128xf32> to vector<2x32xf32>
    %255 = arith.negf %254 : vector<2x32xf32>
    %256 = math.exp %255 : vector<2x32xf32>
    %cst_68 = arith.constant 1.000000e+00 : f32
    %257 = vector.broadcast %cst_68 : f32 to vector<2x32xf32>
    %258 = arith.addf %257, %256 : vector<2x32xf32>
    %259 = arith.divf %257, %258 : vector<2x32xf32>
    %260 = vector.extract_strided_slice %253 {offsets = [0, 32], sizes = [2, 32], strides = [1, 1]} : vector<2x128xf32> to vector<2x32xf32>
    %261 = arith.negf %260 : vector<2x32xf32>
    %262 = math.exp %261 : vector<2x32xf32>
    %cst_69 = arith.constant 1.000000e+00 : f32
    %263 = vector.broadcast %cst_69 : f32 to vector<2x32xf32>
    %264 = arith.addf %263, %262 : vector<2x32xf32>
    %265 = arith.divf %263, %264 : vector<2x32xf32>
    %266 = vector.extract_strided_slice %253 {offsets = [0, 64], sizes = [2, 32], strides = [1, 1]} : vector<2x128xf32> to vector<2x32xf32>
    %267 = math.tanh %266 : vector<2x32xf32>
    %268 = vector.extract_strided_slice %253 {offsets = [0, 96], sizes = [2, 32], strides = [1, 1]} : vector<2x128xf32> to vector<2x32xf32>
    %269 = arith.negf %268 : vector<2x32xf32>
    %270 = math.exp %269 : vector<2x32xf32>
    %cst_70 = arith.constant 1.000000e+00 : f32
    %271 = vector.broadcast %cst_70 : f32 to vector<2x32xf32>
    %272 = arith.addf %271, %270 : vector<2x32xf32>
    %273 = arith.divf %271, %272 : vector<2x32xf32>
    %274 = arith.mulf %265, %242 : vector<2x32xf32>
    %275 = arith.mulf %259, %267 : vector<2x32xf32>
    %276 = arith.addf %274, %275 : vector<2x32xf32>
    %277 = math.tanh %276 : vector<2x32xf32>
    %278 = arith.mulf %273, %277 : vector<2x32xf32>
    %279 = arith.index_cast %c7_i32 : i32 to index
    %c0_71 = arith.constant 0 : index
    %c0_72 = arith.constant 0 : index
    %280 = vector.load %arg8[%279, %c0_71, %c0_72] : memref<8x2x32xf32, #tpu.memory_space<vmem>>, vector<1x2x32xf32>
    %281 = vector.shape_cast %280 : vector<1x2x32xf32> to vector<2x32xf32>
    %282 = vector.shape_cast %278 : vector<2x32xf32> to vector<1x2x32xf32>
    tpu.vector_store %arg8[%279, %c0_71, %c0_72], %282 {strides = array<i32>} : memref<8x2x32xf32, #tpu.memory_space<vmem>>, vector<1x2x32xf32>,
    %c8_i32 = arith.constant 8 : i32
    %c0_73 = arith.constant 0 : index
    %c0_74 = arith.constant 0 : index
    %c0_75 = arith.constant 0 : index
    %283 = vector.load %arg6[%c0_73, %c0_74, %c0_75] : memref<1x2x32xf32, #tpu.memory_space<vmem>>, vector<1x2x32xf32>
    %284 = vector.shape_cast %283 : vector<1x2x32xf32> to vector<2x32xf32>
    %285 = vector.shape_cast %278 : vector<2x32xf32> to vector<1x2x32xf32>
    tpu.vector_store %arg6[%c0_73, %c0_74, %c0_75], %285 {strides = array<i32>} : memref<1x2x32xf32, #tpu.memory_space<vmem>>, vector<1x2x32xf32>,
    %c0_76 = arith.constant 0 : index
    %c0_77 = arith.constant 0 : index
    %c0_78 = arith.constant 0 : index
    %286 = vector.load %arg7[%c0_76, %c0_77, %c0_78] : memref<1x2x32xf32, #tpu.memory_space<vmem>>, vector<1x2x32xf32>
    %287 = vector.shape_cast %286 : vector<1x2x32xf32> to vector<2x32xf32>
    %288 = vector.shape_cast %276 : vector<2x32xf32> to vector<1x2x32xf32>
    tpu.vector_store %arg7[%c0_76, %c0_77, %c0_78], %288 {strides = array<i32>} : memref<1x2x32xf32, #tpu.memory_space<vmem>>, vector<1x2x32xf32>,
    return
  }
  func.func @transform_0(%arg0: i32) -> (i32, i32, i32) {
    %c0_i32 = arith.constant 0 : i32
    %c0_i32_0 = arith.constant 0 : i32
    %c0_i32_1 = arith.constant 0 : i32
    %c0_i32_2 = arith.constant 0 : i32
    return %c0_i32, %c0_i32_0, %c0_i32_1 : i32, i32, i32
  }
  func.func @transform_1(%arg0: i32) -> (i32, i32) {
    %c0_i32 = arith.constant 0 : i32
    %c0_i32_0 = arith.constant 0 : i32
    %c0_i32_1 = arith.constant 0 : i32
    return %c0_i32, %c0_i32_0 : i32, i32
  }
  func.func @transform_2(%arg0: i32) -> (i32, i32, i32) {
    %c0_i32 = arith.constant 0 : i32
    %c0_i32_0 = arith.constant 0 : i32
    %c0_i32_1 = arith.constant 0 : i32
    return %arg0, %c0_i32, %c0_i32_0 : i32, i32, i32
  }
  func.func @transform_3(%arg0: i32) -> (i32, i32, i32) {
    %c0_i32 = arith.constant 0 : i32
    %c0_i32_0 = arith.constant 0 : i32
    %c0_i32_1 = arith.constant 0 : i32
    return %arg0, %c0_i32, %c0_i32_0 : i32, i32, i32
  }
  func.func @transform_4(%arg0: i32) -> (i32, i32, i32) {
    %c0_i32 = arith.constant 0 : i32
    %c0_i32_0 = arith.constant 0 : i32
    %c0_i32_1 = arith.constant 0 : i32
    return %arg0, %c0_i32, %c0_i32_0 : i32, i32, i32
  }
  func.func @transform_5(%arg0: i32) -> (i32, i32, i32) {
    %c0_i32 = arith.constant 0 : i32
    %c0_i32_0 = arith.constant 0 : i32
    %c0_i32_1 = arith.constant 0 : i32
    return %arg0, %c0_i32, %c0_i32_0 : i32, i32, i32
  }
  func.func @transform_6(%arg0: i32) -> (i32, i32, i32) {
    %c0_i32 = arith.constant 0 : i32
    %c0_i32_0 = arith.constant 0 : i32
    %c0_i32_1 = arith.constant 0 : i32
    return %arg0, %c0_i32, %c0_i32_0 : i32, i32, i32
  }
}

</mosaic_0001>

<bundles_post_ra>
// kernel: encoder_forward.1
= control target key start
LH: loop header
LB: loop body
LE: loop exit
PB: predicated region body
PF: predicated region fallthrough
CT: control target
= control target key end

     0   :  { %12 = vsyncpa [#allocation5], 0  ;;  %s2520_s0 = inlined_call_operand.vmem [shape: f32[8,2,32], index: 0, kind: input, shape index: {}]   ;;  %s2521_s1 = inlined_call_operand.vmem [shape: f32[32,128], index: 1, kind: input, shape index: {}]   ;;  %s2522_s2 = inlined_call_operand.vmem [shape: f32[2,32,128], index: 2, kind: input, shape index: {}]   ;;  %s2523_s3 = inlined_call_operand.vmem [shape: f32[2,32,128], index: 3, kind: input, shape index: {}]   ;;  %s2524_s4 = inlined_call_operand.vmem [shape: f32[2,1,128], index: 4, kind: input, shape index: {}]   ;;  %s2525_s5 = inlined_call_operand.hbm [shape: f32[2,2,32], index: 5, kind: output, shape index: {0}]   ;;  %s2526_s6 = inlined_call_operand.hbm [shape: f32[2,2,32], index: 6, kind: output, shape index: {1}]  }
   0x1   :  { %14 = vsyncpa [#allocation5 + $0x1], 0 }
   0x2   :  { %15 = vsyncpa [#allocation7], 0 }
   0x3   :  { %17 = vsyncpa [#allocation7 + $0x1], 0  ;;  %s2213_s21 = smov 0   ;;  %s2215_s22 = smov 0  }
   0x4   :  { %s2217_s23 = smov 0   ;;  %s2219_s24 = smov 0  }
   0x5 LB: > { %s2234_s25 = sadd.s32 4294967295, %s2166_s24   ;;  %s1683_s26 = sadd.s32 4294967294, %s2166_s24   ;;  %s2166_s24 = sphi %s2219_s24, %s2532_s24   ;;  %s2162_s23 = sphi %s2217_s23, %s2531_s23   ;;  %s2158_s22 = sphi %s2215_s22, %s2530_s22   ;;  %s2154_s21 = sphi %s2213_s21, %s2529_s21  }
   0x6   : > { %s2238_s27 = sadd.s32 1, %s2166_s24   ;;  %s150_s28 = sadd.s32 1, %s2162_s23 }
   0x7   : > { %s147_s29 = ssub.s32 %s2166_s24, %s2238_s27  ;;  %p160_p0 = scmp.ne.s32.totalorder %s2162_s23, %s2158_s22 }
   0x8   : > { %p148_p1 = scmp.eq.s32.totalorder %s147_s29, 0  ;;  %p161_p2 = scmp.eq.s32.totalorder %s2234_s25, 1 }
   0x9   : > { %p166_p3 = scmp.ne.s32.totalorder %s2158_s22, %s2154_s21  ;;  %p167_p4 = scmp.eq.s32.totalorder %s1683_s26, 1 }
   0xa   : > { %s2249_s30 = scalar_select %p148_p1, %s2162_s23, %s150_s28  }
   0xb   : > { %p2251_p5 = por %p161_p2, %p160_p0  ;;  %p2255_p6 = por %p167_p4, %p166_p3 }
   0xc   : > { %p1686_p7 = scmp.ge.s32.totalorder %s2166_s24, 1  ;;  %p239_p8 = scmp.lt.s32.totalorder %s2166_s24, 3 }
   0xe   : > { %p240_p9 = pnand %p1686_p7, %p239_p8 }
   0xf   : > { %s2262_s9 = sand.u32 (!%p240_p9), 1, %s2158_s22   ;;  %p282_p10 = scmp.lt.s32.totalorder (!%p240_p9), %s2234_s25, 1 }
  0x10   : > { %243 = sbr.rel (%p240_p9) target bundleno = 6133 (0x17f5), region = 40  ;;  %s1687_s10 = sshll.u32 (!%p240_p9), %s2262_s9, 1 }
  0x11   : > { %s2282_s28 = scalar_lea.vmem (!%p240_p9), [#allocation4], %s1687_s10  ;;  %s2284_s29 = scalar_lea.vmem (!%p240_p9), [#allocation6], %s1687_s10 }
  0x12   : > { %p1693_p11 = scmp.ne.s32.totalorder (!%p240_p9), %s2234_s25, 0 }
  0x17   : > { %s283_s11 = scalar_select %p282_p10, %s2234_s25, 1 }
  0x18   : > { %299 = sbr.rel (%p1693_p11) target bundleno = 258 (0x102), region = 44  ;;  %v308_v1 = vld [vmem:[%s2521_s1] sm:$0xff] (!%p1693_p11)  ;;  %v309_v2 = vld [vmem:[%s2521_s1 + $0x8] sm:$0xff] (!%p1693_p11)  ;;  %v310_v3 = vld [vmem:[%s2521_s1 + $0x10] sm:$0xff] (!%p1693_p11)  ;;  %v313_v4 = vlaneseq (!%p1693_p11)  ;;  %v2168_v9 = vmov (!%p1693_p11), 1983009808  }
  0x19   : > { %s1728_s12 = sshll.u32 %s283_s11, 5  ;;  %s294_s15 = scalar_lea.vmem %s2524_s4, %s283_s11  ;;  %v1892_v5 = vpack.c.bf16 (!%p1693_p11), %v309_v2, %v308_v1  ;;  %v311_v6 = vld [vmem:[%s2521_s1 + $0x18] sm:$0xff] (!%p1693_p11)  ;;  %v300_v7 = vld [vmem:[%s2520_s0] sm:$0x3] (!%p1693_p11)  ;;  %v301_v8 = vld [vmem:[%s2520_s0 + $0x2] sm:$0x3] (!%p1693_p11)  ;;  %v329_v10 = vunpack.c.l.s4 (!%p1693_p11), %v2168_v9 }
  0x1a   : > { %s2273_s18 = scalar_lea.vmem %s2522_s2, %s1728_s12  ;;  %s2278_s26 = scalar_lea.vmem %s2523_s3, %s1728_s12  ;;  %v2280_v0 = vld [vmem:[%s294_s15] sm:$0x1]  ;;  %v1896_v11 = vpack.c.bf16 (!%p1693_p11), %v311_v6, %v310_v3  ;;  %v302_v12 = vld [vmem:[%s2520_s0 + $0x4] sm:$0x3] (!%p1693_p11)  ;;  %v303_v13 = vld [vmem:[%s2520_s0 + $0x6] sm:$0x3] (!%p1693_p11)  ;;  %v326_v15 = vcombine.low (!%p1693_p11), %v300_v7, %v301_v8 }
  0x1b   : > { %v314_v14 = vshrl.u32 (!%p1693_p11), %v313_v4, 7  ;;  %1893 = vmatprep.subr.bf16.mxu0 (!%p1693_p11), %v1892_v5  ;;  %v327_v16 = vcombine.low (!%p1693_p11), %v302_v12, %v303_v13  ;;  %v330_v17 = vunpack.c.0.s8 (!%p1693_p11), %v329_v10  ;;  %v304_v18 = vld [vmem:[%s2520_s0 + $0x8] sm:$0x3] (!%p1693_p11)  ;;  %v305_v19 = vld [vmem:[%s2520_s0 + $0xa] sm:$0x3] (!%p1693_p11)  ;;  %vm360_vm0 = vcmask (!%p1693_p11), 261120  }
  0x1c   : > { %v306_v20 = vld [vmem:[%s2520_s0 + $0xc] sm:$0x3] (!%p1693_p11)  ;;  %1895 = vmatpush3.bf16.msra.mxu0 (!%p1693_p11), %v1892_v5  ;;  %v307_v21 = vld [vmem:[%s2520_s0 + $0xe] sm:$0x3] (!%p1693_p11)  ;;  %v343_v22 = vcombine.low (!%p1693_p11), %v304_v18, %v305_v19 }
  0x1d   : > { %1897 = vmatprep.subr.bf16.mxu0 (!%p1693_p11), %v1896_v11  ;;  %v333_v23 = vsub.s32 (!%p1693_p11), %v330_v17, %v314_v14  ;;  %v344_v24 = vcombine.low (!%p1693_p11), %v306_v20, %v307_v21  ;;  %v315_v31 = vsub.s32 (!%p1693_p11), 0, %v314_v14 }
  0x1f   : > { %v334_v25 = vrot.slane %v326_v15, %v333_v23  ;;  %v341_v26 = vrot.slane %v327_v16, %v333_v23  ;;  %v351_v27 = vrot.slane %v343_v22, %v333_v23  ;;  %v358_v28 = vrot.slane %v344_v24, %v333_v23 }
  0x20   : > { %1899 = vmatpush3.bf16.msra.mxu0 %v1896_v11  ;;  %v316_v32 = vrot.slane %v2280_v0, %v315_v31 }
  0x21   : > { %v342_v29 = vcombine.low %v334_v25, %v341_v26  ;;  %v359_v30 = vcombine.low %v351_v27, %v358_v28 }
  0x23   : > { %1790 = vmatprep.mubr.msk.f32.mxu0 %vm360_vm0, %v342_v29 }
  0x24   : > { %1791 = vmatmul.mubr.msk.f32.vlgmr.msra.gmra.mrb[0].mxu0 %vm360_vm0, %v359_v30 }
  0xf7   : > { %v1792_v33 = vpop.f32.mrb[0].mxu0 }
  0xf8   : > { %v437_v34 = vadd.f32 %v1792_v33, %v316_v32  ;;  %v431_v35 = vpop.f32.mrb[1].mxu0 }
  0xf9   : > { %v432_v36 = vadd.f32 %v431_v35, %v316_v32 }
  0xfa   : > { %v459_v37 = vcombine.high %v437_v34, %v437_v34  ;;  %v466_v38 = vrot.slane %v437_v34, %v333_v23  ;;  %1698 = vst.sshfl [vmem:[#allocation3 + $0x8] sm:$0x3 pattern:$0x76325410] %v437_v34 }
  0xfb   : > { %v442_v39 = vcombine.high %v432_v36, %v432_v36  ;;  %v449_v40 = vrot.slane %v432_v36, %v333_v23  ;;  %1696 = vst.sshfl [vmem:[#allocation3] sm:$0x3 pattern:$0x76325410] %v432_v36 }
  0xfc   : > { %v473_v41 = vrot.slane %v459_v37, %v333_v23  ;;  %v474_v42 = vcombine.high %v466_v38, %v466_v38  ;;  %1699 = vst.sshfl [vmem:[#allocation3 + $0xc] sm:$0x3 pattern:$0x76325410] %v459_v37 }
  0xfd   : > { %v456_v43 = vrot.slane %v442_v39, %v333_v23  ;;  %v457_v44 = vcombine.high %v449_v40, %v449_v40  ;;  %1697 = vst.sshfl [vmem:[#allocation3 + $0x4] sm:$0x3 pattern:$0x76325410] %v442_v39 }
  0xfe   : > { %v475_v45 = vcombine.high %v473_v41, %v473_v41  ;;  %489 = vst [vmem:[#allocation3 + $0xa] sm:$0x3] %v474_v42 }
  0xff   : > { %v458_v46 = vcombine.high %v456_v43, %v456_v43  ;;  %485 = vst [vmem:[#allocation3 + $0x2] sm:$0x3] %v457_v44 }
 0x100   : > { %491 = vst [vmem:[#allocation3 + $0xe] sm:$0x3] %v475_v45 }
 0x101   : > { %487 = vst [vmem:[#allocation3 + $0x6] sm:$0x3] %v458_v46 }
 0x102 PF: > { %p1700_p12 = scmp.le.s32.totalorder %s2234_s25, 0 }
 0x103   : > { %v504_v47 = vld [vmem:[%s2273_s18] sm:$0xff] (!%p1700_p12)  ;;  %v505_v48 = vld [vmem:[%s2273_s18 + $0x8] sm:$0xff] (!%p1700_p12)  ;;  %v506_v49 = vld [vmem:[%s2273_s18 + $0x10] sm:$0xff] (!%p1700_p12)  ;;  %v509_v50 = vlaneseq (!%p1700_p12)  ;;  %v2169_v55 = vmov (!%p1700_p12), 1983009808   ;;  %vm556_vm1 = vcmask (!%p1700_p12), 261120  }
 0x104   : > { %495 = sbr.rel (%p1700_p12) target bundleno = 493 (0x1ed), region = 48  ;;  %v1900_v51 = vpack.c.bf16 (!%p1700_p12), %v505_v48, %v504_v47  ;;  %v507_v52 = vld [vmem:[%s2273_s18 + $0x18] sm:$0xff] (!%p1700_p12)  ;;  %v496_v53 = vld [vmem:[#allocation2] sm:$0x3] (!%p1700_p12)  ;;  %v497_v54 = vld [vmem:[#allocation2 + $0x2] sm:$0x3] (!%p1700_p12)  ;;  %v525_v56 = vunpack.c.l.s4 (!%p1700_p12), %v2169_v55 }
 0x105   : > { %v1904_v57 = vpack.c.bf16 (!%p1700_p12), %v507_v52, %v506_v49  ;;  %v498_v58 = vld [vmem:[#allocation2 + $0x4] sm:$0x3] (!%p1700_p12)  ;;  %v499_v59 = vld [vmem:[#allocation2 + $0x6] sm:$0x3] (!%p1700_p12)  ;;  %v510_v60 = vshrl.u32 (!%p1700_p12), %v509_v50, 7  ;;  %v522_v61 = vcombine.low (!%p1700_p12), %v496_v53, %v497_v54 }
 0x106   : > { %1901 = vmatprep.subr.bf16.mxu0 (!%p1700_p12), %v1900_v51  ;;  %v523_v62 = vcombine.low (!%p1700_p12), %v498_v58, %v499_v59  ;;  %v526_v63 = vunpack.c.0.s8 (!%p1700_p12), %v525_v56  ;;  %v500_v1 = vld [vmem:[#allocation2 + $0x8] sm:$0x3] (!%p1700_p12)  ;;  %v501_v2 = vld [vmem:[#allocation2 + $0xa] sm:$0x3] (!%p1700_p12)  ;;  %v502_v3 = vld [vmem:[#allocation2 + $0xc] sm:$0x3] (!%p1700_p12) }
 0x107   : > { %1903 = vmatpush3.bf16.msra.mxu0 (!%p1700_p12), %v1900_v51  ;;  %v503_v4 = vld [vmem:[#allocation2 + $0xe] sm:$0x3] (!%p1700_p12)  ;;  %v539_v5 = vcombine.low (!%p1700_p12), %v500_v1, %v501_v2  ;;  %v511_v14 = vsub.s32 (!%p1700_p12), 0, %v510_v60 }
 0x108   : > { %1905 = vmatprep.subr.bf16.mxu0 (!%p1700_p12), %v1904_v57  ;;  %v529_v6 = vsub.s32 (!%p1700_p12), %v526_v63, %v510_v60  ;;  %v540_v7 = vcombine.low (!%p1700_p12), %v502_v3, %v503_v4 }
 0x109   : > { %v512_v15 = vrot.slane (!%p1700_p12), %v2280_v0, %v511_v14 }
 0x10a   : > { %v530_v8 = vrot.slane (!%p1700_p12), %v522_v61, %v529_v6  ;;  %v537_v9 = vrot.slane (!%p1700_p12), %v523_v62, %v529_v6  ;;  %v547_v10 = vrot.slane (!%p1700_p12), %v539_v5, %v529_v6  ;;  %v554_v11 = vrot.slane (!%p1700_p12), %v540_v7, %v529_v6 }
 0x10b   : > { %1907 = vmatpush3.bf16.msra.mxu0 %v1904_v57 }
 0x10c   : > { %v538_v12 = vcombine.low %v530_v8, %v537_v9  ;;  %v555_v13 = vcombine.low %v547_v10, %v554_v11 }
 0x10e   : > { %1801 = vmatprep.mubr.msk.f32.mxu0 %vm556_vm1, %v538_v12 }
 0x10f   : > { %1802 = vmatmul.mubr.msk.f32.vlgmr.msra.gmra.mrb[0].mxu0 %vm556_vm1, %v555_v13 }
 0x1e2   : > { %v1803_v16 = vpop.f32.mrb[0].mxu0 }
 0x1e3   : > { %v633_v17 = vadd.f32 %v1803_v16, %v512_v15  ;;  %v627_v18 = vpop.f32.mrb[1].mxu0 }
 0x1e4   : > { %v628_v19 = vadd.f32 %v627_v18, %v512_v15 }
 0x1e5   : > { %v655_v20 = vcombine.high %v633_v17, %v633_v17  ;;  %v662_v21 = vrot.slane %v633_v17, %v529_v6  ;;  %1705 = vst.sshfl [vmem:[#allocation3 + $0x8] sm:$0x3 pattern:$0x76325410] %v633_v17 }
 0x1e6   : > { %v638_v22 = vcombine.high %v628_v19, %v628_v19  ;;  %v645_v23 = vrot.slane %v628_v19, %v529_v6  ;;  %1703 = vst.sshfl [vmem:[#allocation3] sm:$0x3 pattern:$0x76325410] %v628_v19 }
 0x1e7   : > { %v669_v24 = vrot.slane %v655_v20, %v529_v6  ;;  %v670_v25 = vcombine.high %v662_v21, %v662_v21  ;;  %1706 = vst.sshfl [vmem:[#allocation3 + $0xc] sm:$0x3 pattern:$0x76325410] %v655_v20 }
 0x1e8   : > { %v652_v26 = vrot.slane %v638_v22, %v529_v6  ;;  %v653_v27 = vcombine.high %v645_v23, %v645_v23  ;;  %1704 = vst.sshfl [vmem:[#allocation3 + $0x4] sm:$0x3 pattern:$0x76325410] %v638_v22 }
 0x1e9   : > { %v671_v28 = vcombine.high %v669_v24, %v669_v24  ;;  %685 = vst [vmem:[#allocation3 + $0xa] sm:$0x3] %v670_v25 }
 0x1ea   : > { %v654_v29 = vcombine.high %v652_v26, %v652_v26  ;;  %681 = vst [vmem:[#allocation3 + $0x2] sm:$0x3] %v653_v27 }
 0x1eb   : > { %687 = vst [vmem:[#allocation3 + $0xe] sm:$0x3] %v671_v28 }
 0x1ec   : > { %683 = vst [vmem:[#allocation3 + $0x6] sm:$0x3] %v654_v29 }
 0x1ed PF: > { %v688_v0 = vld [vmem:[%s2278_s26] sm:$0xff]  ;;  %v689_v30 = vld [vmem:[%s2278_s26 + $0x8] sm:$0xff]  ;;  %v690_v31 = vld [vmem:[%s2278_s26 + $0x10] sm:$0xff]  ;;  %v2170_v32 = vmov 0.0|0.0   ;;  %vm2171_vm2 = vmmov 0   ;;  %v2172_v35 = vmov 0.0  }
 0x1ee   : > { %1908 = vmatprep.subr.bf16.mxu0 %v2170_v32  ;;  %v2334_v33 = vpack.c.bf16 %v689_v30, %v688_v0  ;;  %v691_v34 = vld [vmem:[%s2278_s26 + $0x18] sm:$0xff]  ;;  %1812 = vmatprep.mubr.msk.f32.mxu0 %vm2171_vm2, %v2172_v35  ;;  %v692_v37 = vld [vmem:[#allocation3] sm:$0x3]  ;;  %s2173_s18 = smov 64   ;;  %s2174_s26 = smov 32   ;;  %vm796_vm3 = vcmask 254976  }
 0x1ef   : > { %1914 = vmatprep.subr.bf16.mxu1 %v2170_v32  ;;  %1823 = vmatprep.mubr.msk.f32.mxu1 %vm2171_vm2, %v2172_v35  ;;  %v2343_v36 = vpack.c.bf16 %v691_v34, %v690_v31  ;;  %vm693_vm4 = vcmask 261120   ;;  %v904_v10 = vld [vmem:[#allocation3 + $0x4] sm:$0x3]  ;;  %s2175_s17 = smov 96   ;;  %s1724_s12 = sshll.u32 %s2234_s25, 5 }
 0x1f0   : > { %1910 = vmatpush3.bf16.msra.mxu0 %v2334_v33  ;;  %1916 = vmatpush3.bf16.msra.mxu1 %v2334_v33  ;;  %s1571_s15 = sshll.u32 %s2284_s29, 4  ;;  %s2440_s20 = scalar_lea.hbm %s2526_s6, %s1724_s12  ;;  %s2442_s15 = int_to_ptr.vmem [resolvable:$true] %s1571_s15 }
 0x1f1   : > { %1911 = vmatprep.subr.bf16.mxu0 %v2170_v32  ;;  %1917 = vmatprep.subr.bf16.mxu1 %v2170_v32  ;;  %v799_v55 = vld [vmem:[#allocation3 + $0x2] sm:$0x3]  ;;  %s1545_s11 = scalar_lea.sflag [#allocation7], %s2262_s9  ;;  %s2072_s13 = scalar_lea.vmem %s2442_s15, 32 }
 0x1f2   : > { %p2073_p13 = scmp.ne.s32.totalorder %s2442_s15, %s2072_s13  ;;  %s2176_s14 = smov [#allocation6]  }
 0x1f3   : > { %v1009_v28 = vld [vmem:[#allocation3 + $0x6] sm:$0x3]  ;;  %s2076_s16 = sshll.u32 %s2176_s14, 4  ;;  %s2077_s16 = int_to_ptr.vmem [resolvable:$false] %s2076_s16 }
 0x1f4   : > { %1913 = vmatpush3.bf16.msra.mxu0 %v2343_v36  ;;  %1919 = vmatpush3.bf16.msra.mxu1 %v2343_v36  ;;  %p2074_p0 = pnand %p2073_p13, %p2251_p5  ;;  %p2079_p2 = scmp.lt.s32.totalorder %s2442_s15, %s2077_s16 }
 0x1f5   : > { %1920 = vmatprep.subr.bf16.mxu0 %v2170_v32  ;;  %1926 = vmatprep.subr.bf16.mxu1 %v2170_v32 }
 0x1f6   : > { %p2075_p1 = pneg %p2074_p0 }
 0x1f7   : > { %1813 = vmatmul.mubr.f32.vlgmr.msra.gmra.mrb[0].mxu0 %v2172_v35 }
 0x1f8   : > { %1922 = vmatpush3.bf16.msra.mxu0 %v2334_v33  ;;  %1834 = vmatprep.mubr.msk.f32.mxu0 %vm2171_vm2, %v2172_v35 }
 0x1f9   : > { %1923 = vmatprep.subr.bf16.mxu0 %v2170_v32 }
 0x1fc   : > { %1925 = vmatpush3.bf16.msra.mxu0 %v2343_v36 }
 0x1fd   : > { %1932 = vmatprep.subr.bf16.mxu0 %v2170_v32 }
 0x2ca   : > { %v763_v38 = vpop.f32.mrb[0].mxu0 }
 0x2cb   : > { %v767_v39 = vadd.f32 %v763_v38, %v692_v37  ;;  %v1814_v40 = vpop.f32.mrb[1].mxu0 }
 0x2cd   : > { %2008 = vtanh.f32 %v767_v39  ;;  %v1707_v42 = vmul.f32 -1.442695, %v767_v39 }
 0x2cf   : > { %2010 = vpow2.f32 %v1707_v42 }
 0x2d7   : > { %v2009_v41 = vpop.eup %2008 }
 0x2d8   : > { %777 = vrot.lane.b32.xlu0 %v2009_v41, %s2173_s18 }
 0x2d9   : > { %v2011_v43 = vpop.eup %2010 }
 0x2da   : > { %v771_v44 = vadd.f32 1.0, %v2011_v43 }
 0x2dc   : > { %2012 = vrcp.f32 %v771_v44 }
 0x2e6   : > { %v2013_v45 = vpop.eup %2012 }
 0x2e7   : > { %v775_v48 = vmul.f32 0.0, %v2013_v45 }
 0x34a   : > { %v778_v46 = vpop.permute.xlu0 %777 }
 0x34b   : > { %v780_v47 = vmul.f32 %v2013_v45, %v778_v46 }
 0x34d   : > { %782 = vrot.lane.b32.xlu0 %v780_v47, %s2174_s26 }
 0x3bf   : > { %v783_v49 = vpop.permute.xlu0 %782 }
 0x3c0   : > { %v785_v50 = vadd.f32 %v783_v49, %v775_v48  ;;  %v1114_v49 = vld [vmem:[#allocation3 + $0x8] sm:$0x3] }
 0x3c2   : > { %2014 = vtanh.f32 %v785_v50 }
 0x3cc   : > { %v2015_v51 = vpop.eup %2014 }
 0x3cd   : > { %788 = vrot.lane.b32.xlu1 %v2015_v51, %s2173_s18 }
 0x43f   : > { %v789_v52 = vpop.permute.xlu1 %788 }
 0x440   : > { %v791_v53 = vmul.f32 %v2013_v45, %v789_v52 }
 0x442   : > { %793 = vrot.lane.b32.xlu1 %v791_v53, %s2174_s26 }
 0x4b4   : > { %v794_v54 = vpop.permute.xlu1 %793 }
 0x4b5   : > { %797 = vst.msk [vmem:[#allocation2] sm:$0x3] %vm796_vm3, %v794_v54  ;;  %1824 = vmatmul.mubr.msk.f32.vlgmr.msra.gmra.mrb[0].mxu1 %vm693_vm4, %v794_v54 }
 0x4b6   : > { %1928 = vmatpush3.bf16.msra.mxu1 %v2334_v33  ;;  %1845 = vmatprep.mubr.msk.f32.mxu1 %vm2171_vm2, %v2172_v35 }
 0x4b7   : > { %1929 = vmatprep.subr.bf16.mxu1 %v2170_v32 }
 0x4ba   : > { %1931 = vmatpush3.bf16.msra.mxu1 %v2343_v36 }
 0x4bb   : > { %1938 = vmatprep.subr.bf16.mxu1 %v2170_v32 }
 0x588   : > { %v868_v56 = vpop.f32.mrb[0].mxu1 }
 0x589   : > { %v872_v57 = vadd.f32 %v868_v56, %v799_v55  ;;  %v1825_v58 = vpop.f32.mrb[1].mxu1 }
 0x58b   : > { %2016 = vtanh.f32 %v872_v57  ;;  %v1709_v60 = vmul.f32 -1.442695, %v872_v57 }
 0x58d   : > { %2018 = vpow2.f32 %v1709_v60 }
 0x595   : > { %v2017_v59 = vpop.eup %2016 }
 0x596   : > { %882 = vrot.lane.b32.xlu0 %v2017_v59, %s2173_s18 }
 0x597   : > { %v2019_v61 = vpop.eup %2018 }
 0x598   : > { %v876_v62 = vadd.f32 1.0, %v2019_v61 }
 0x59a   : > { %2020 = vrcp.f32 %v876_v62 }
 0x5a4   : > { %v2021_v63 = vpop.eup %2020 }
 0x5a5   : > { %v880_v3 = vmul.f32 %v2021_v63, %v785_v50 }
 0x608   : > { %v883_v1 = vpop.permute.xlu0 %882 }
 0x609   : > { %v885_v2 = vmul.f32 %v2021_v63, %v883_v1 }
 0x60b   : > { %887 = vrot.lane.b32.xlu1 %v885_v2, %s2174_s26 }
 0x67d   : > { %v888_v4 = vpop.permute.xlu1 %887 }
 0x67e   : > { %v890_v5 = vadd.f32 %v888_v4, %v880_v3  ;;  %v1219_v4 = vld [vmem:[#allocation3 + $0xa] sm:$0x3] }
 0x680   : > { %2022 = vtanh.f32 %v890_v5 }
 0x68a   : > { %v2023_v6 = vpop.eup %2022 }
 0x68b   : > { %893 = vrot.lane.b32.xlu0 %v2023_v6, %s2173_s18 }
 0x6fd   : > { %v894_v7 = vpop.permute.xlu0 %893 }
 0x6fe   : > { %v896_v8 = vmul.f32 %v2021_v63, %v894_v7 }
 0x700   : > { %898 = vrot.lane.b32.xlu1 %v896_v8, %s2174_s26 }
 0x772   : > { %v899_v9 = vpop.permute.xlu1 %898 }
 0x773   : > { %902 = vst.msk [vmem:[#allocation2 + $0x2] sm:$0x3] %vm796_vm3, %v899_v9  ;;  %1835 = vmatmul.mubr.msk.f32.vlgmr.msra.gmra.mrb[2].mxu0 %vm693_vm4, %v899_v9 }
 0x774   : > { %1934 = vmatpush3.bf16.msra.mxu0 %v2334_v33  ;;  %1856 = vmatprep.mubr.msk.f32.mxu0 %vm2171_vm2, %v2172_v35 }
 0x775   : > { %1935 = vmatprep.subr.bf16.mxu0 %v2170_v32 }
 0x778   : > { %1937 = vmatpush3.bf16.msra.mxu0 %v2343_v36 }
 0x779   : > { %1944 = vmatprep.subr.bf16.mxu0 %v2170_v32 }
 0x846   : > { %v973_v11 = vpop.f32.mrb[2].mxu0 }
 0x847   : > { %v977_v12 = vadd.f32 %v973_v11, %v904_v10  ;;  %v1836_v13 = vpop.f32.mrb[3].mxu0 }
 0x849   : > { %2024 = vtanh.f32 %v977_v12  ;;  %v1711_v15 = vmul.f32 -1.442695, %v977_v12 }
 0x84b   : > { %2026 = vpow2.f32 %v1711_v15 }
 0x853   : > { %v2025_v14 = vpop.eup %2024 }
 0x854   : > { %987 = vrot.lane.b32.xlu0 %v2025_v14, %s2173_s18 }
 0x855   : > { %v2027_v16 = vpop.eup %2026 }
 0x856   : > { %v981_v17 = vadd.f32 1.0, %v2027_v16 }
 0x858   : > { %2028 = vrcp.f32 %v981_v17 }
 0x862   : > { %v2029_v18 = vpop.eup %2028 }
 0x863   : > { %v985_v21 = vmul.f32 %v2029_v18, %v890_v5 }
 0x8c6   : > { %v988_v19 = vpop.permute.xlu0 %987 }
 0x8c7   : > { %v990_v20 = vmul.f32 %v2029_v18, %v988_v19 }
 0x8c9   : > { %992 = vrot.lane.b32.xlu1 %v990_v20, %s2174_s26 }
 0x93b   : > { %v993_v22 = vpop.permute.xlu1 %992 }
 0x93c   : > { %v995_v23 = vadd.f32 %v993_v22, %v985_v21 }
 0x93e   : > { %2030 = vtanh.f32 %v995_v23 }
 0x948   : > { %v2031_v24 = vpop.eup %2030 }
 0x949   : > { %998 = vrot.lane.b32.xlu0 %v2031_v24, %s2173_s18 }
 0x9bb   : > { %v999_v25 = vpop.permute.xlu0 %998 }
 0x9bc   : > { %v1001_v26 = vmul.f32 %v2029_v18, %v999_v25  ;;  %v1324_v18 = vld [vmem:[#allocation3 + $0xc] sm:$0x3] }
 0x9be   : > { %1003 = vrot.lane.b32.xlu1 %v1001_v26, %s2174_s26 }
 0xa30   : > { %v1004_v27 = vpop.permute.xlu1 %1003 }
 0xa31   : > { %1007 = vst.msk [vmem:[#allocation2 + $0x4] sm:$0x3] %vm796_vm3, %v1004_v27  ;;  %1846 = vmatmul.mubr.msk.f32.vlgmr.msra.gmra.mrb[2].mxu1 %vm693_vm4, %v1004_v27 }
 0xa32   : > { %1940 = vmatpush3.bf16.msra.mxu1 %v2334_v33  ;;  %1867 = vmatprep.mubr.msk.f32.mxu1 %vm2171_vm2, %v2172_v35 }
 0xa33   : > { %1941 = vmatprep.subr.bf16.mxu1 %v2170_v32 }
 0xa36   : > { %1943 = vmatpush3.bf16.msra.mxu1 %v2343_v36 }
 0xa37   : > { %1950 = vmatprep.subr.bf16.mxu1 %v2170_v32 }
 0xb04   : > { %v1078_v29 = vpop.f32.mrb[2].mxu1 }
 0xb05   : > { %v1082_v0 = vadd.f32 %v1078_v29, %v1009_v28  ;;  %v1847_v30 = vpop.f32.mrb[3].mxu1 }
 0xb07   : > { %2032 = vtanh.f32 %v1082_v0  ;;  %v1713_v34 = vmul.f32 -1.442695, %v1082_v0 }
 0xb09   : > { %2034 = vpow2.f32 %v1713_v34 }
 0xb11   : > { %v2033_v31 = vpop.eup %2032 }
 0xb12   : > { %1092 = vrot.lane.b32.xlu0 %v2033_v31, %s2173_s18 }
 0xb13   : > { %v2035_v37 = vpop.eup %2034 }
 0xb14   : > { %v1086_v38 = vadd.f32 1.0, %v2035_v37 }
 0xb16   : > { %2036 = vrcp.f32 %v1086_v38 }
 0xb20   : > { %v2037_v39 = vpop.eup %2036 }
 0xb21   : > { %v1090_v42 = vmul.f32 %v2037_v39, %v995_v23 }
 0xb84   : > { %v1093_v40 = vpop.permute.xlu0 %1092 }
 0xb85   : > { %v1095_v41 = vmul.f32 %v2037_v39, %v1093_v40 }
 0xb87   : > { %1097 = vrot.lane.b32.xlu1 %v1095_v41, %s2174_s26 }
 0xbf9   : > { %v1098_v43 = vpop.permute.xlu1 %1097 }
 0xbfa   : > { %v1100_v44 = vadd.f32 %v1098_v43, %v1090_v42 }
 0xbfc   : > { %2038 = vtanh.f32 %v1100_v44 }
 0xc06   : > { %v2039_v45 = vpop.eup %2038 }
 0xc07   : > { %1103 = vrot.lane.b32.xlu0 %v2039_v45, %s2173_s18 }
 0xc79   : > { %v1104_v46 = vpop.permute.xlu0 %1103 }
 0xc7a   : > { %v1106_v47 = vmul.f32 %v2037_v39, %v1104_v46  ;;  %v1429_v39 = vld [vmem:[#allocation3 + $0xe] sm:$0x3] }
 0xc7c   : > { %1108 = vrot.lane.b32.xlu1 %v1106_v47, %s2174_s26 }
 0xcee   : > { %v1109_v48 = vpop.permute.xlu1 %1108 }
 0xcef   : > { %1112 = vst.msk [vmem:[#allocation2 + $0x6] sm:$0x3] %vm796_vm3, %v1109_v48  ;;  %1857 = vmatmul.mubr.msk.f32.vlgmr.msra.gmra.mrb[4].mxu0 %vm693_vm4, %v1109_v48 }
 0xcf0   : > { %1946 = vmatpush3.bf16.msra.mxu0 %v2334_v33  ;;  %1878 = vmatprep.mubr.msk.f32.mxu0 %vm2171_vm2, %v2172_v35 }
 0xcf1   : > { %1947 = vmatprep.subr.bf16.mxu0 %v2170_v32 }
 0xcf4   : > { %1949 = vmatpush3.bf16.msra.mxu0 %v2343_v36 }
 0xdc2   : > { %v1183_v50 = vpop.f32.mrb[4].mxu0 }
 0xdc3   : > { %v1187_v51 = vadd.f32 %v1183_v50, %v1114_v49  ;;  %v1858_v52 = vpop.f32.mrb[5].mxu0 }
 0xdc5   : > { %2040 = vtanh.f32 %v1187_v51  ;;  %v1715_v54 = vmul.f32 -1.442695, %v1187_v51 }
 0xdc7   : > { %2042 = vpow2.f32 %v1715_v54 }
 0xdcf   : > { %v2041_v53 = vpop.eup %2040 }
 0xdd0   : > { %1197 = vrot.lane.b32.xlu0 %v2041_v53, %s2173_s18 }
 0xdd1   : > { %v2043_v55 = vpop.eup %2042 }
 0xdd2   : > { %v1191_v56 = vadd.f32 1.0, %v2043_v55 }
 0xdd4   : > { %2044 = vrcp.f32 %v1191_v56 }
 0xdde   : > { %v2045_v57 = vpop.eup %2044 }
 0xddf   : > { %v1195_v60 = vmul.f32 %v2045_v57, %v1100_v44 }
 0xe42   : > { %v1198_v58 = vpop.permute.xlu0 %1197 }
 0xe43   : > { %v1200_v59 = vmul.f32 %v2045_v57, %v1198_v58 }
 0xe45   : > { %1202 = vrot.lane.b32.xlu1 %v1200_v59, %s2174_s26 }
 0xeb7   : > { %v1203_v61 = vpop.permute.xlu1 %1202 }
 0xeb8   : > { %v1205_v62 = vadd.f32 %v1203_v61, %v1195_v60 }
 0xeba   : > { %2046 = vtanh.f32 %v1205_v62 }
 0xec4   : > { %v2047_v63 = vpop.eup %2046 }
 0xec5   : > { %1208 = vrot.lane.b32.xlu0 %v2047_v63, %s2173_s18 }
 0xf37   : > { %v1209_v1 = vpop.permute.xlu0 %1208 }
 0xf38   : > { %v1211_v2 = vmul.f32 %v2045_v57, %v1209_v1 }
 0xf3a   : > { %1213 = vrot.lane.b32.xlu1 %v1211_v2, %s2174_s26 }
 0xfac   : > { %v1214_v3 = vpop.permute.xlu1 %1213 }
 0xfad   : > { %1217 = vst.msk [vmem:[#allocation2 + $0x8] sm:$0x3] %vm796_vm3, %v1214_v3  ;;  %1868 = vmatmul.mubr.msk.f32.vlgmr.msra.gmra.mrb[4].mxu1 %vm693_vm4, %v1214_v3 }
 0xfae   : > { %1952 = vmatpush3.bf16.msra.mxu1 %v2334_v33  ;;  %1889 = vmatprep.mubr.msk.f32.mxu1 %vm2171_vm2, %v2172_v35 }
 0xfaf   : > { %1953 = vmatprep.subr.bf16.mxu1 %v2170_v32 }
 0xfb2   : > { %1955 = vmatpush3.bf16.msra.mxu1 %v2343_v36 }
0x1080   : > { %v1288_v5 = vpop.f32.mrb[4].mxu1 }
0x1081   : > { %v1292_v6 = vadd.f32 %v1288_v5, %v1219_v4  ;;  %v1869_v7 = vpop.f32.mrb[5].mxu1 }
0x1083   : > { %2048 = vtanh.f32 %v1292_v6  ;;  %v1717_v9 = vmul.f32 -1.442695, %v1292_v6 }
0x1085   : > { %2050 = vpow2.f32 %v1717_v9 }
0x108d   : > { %v2049_v8 = vpop.eup %2048 }
0x108e   : > { %1302 = vrot.lane.b32.xlu0 %v2049_v8, %s2173_s18 }
0x108f   : > { %v2051_v10 = vpop.eup %2050 }
0x1090   : > { %v1296_v11 = vadd.f32 1.0, %v2051_v10 }
0x1092   : > { %2052 = vrcp.f32 %v1296_v11 }
0x109c   : > { %v2053_v33 = vpop.eup %2052 }
0x109d   : > { %v1300_v32 = vmul.f32 %v2053_v33, %v1205_v62 }
0x1100   : > { %v1303_v12 = vpop.permute.xlu0 %1302 }
0x1101   : > { %v1305_v35 = vmul.f32 %v2053_v33, %v1303_v12 }
0x1103   : > { %1307 = vrot.lane.b32.xlu1 %v1305_v35, %s2174_s26 }
0x1175   : > { %v1308_v36 = vpop.permute.xlu1 %1307 }
0x1176   : > { %v1310_v13 = vadd.f32 %v1308_v36, %v1300_v32 }
0x1178   : > { %2054 = vtanh.f32 %v1310_v13 }
0x1182   : > { %v2055_v14 = vpop.eup %2054 }
0x1183   : > { %1313 = vrot.lane.b32.xlu0 %v2055_v14, %s2173_s18 }
0x11f5   : > { %v1314_v15 = vpop.permute.xlu0 %1313 }
0x11f6   : > { %v1316_v16 = vmul.f32 %v2053_v33, %v1314_v15 }
0x11f8   : > { %1318 = vrot.lane.b32.xlu1 %v1316_v16, %s2174_s26 }
0x126a   : > { %v1319_v17 = vpop.permute.xlu1 %1318 }
0x126b   : > { %1322 = vst.msk [vmem:[#allocation2 + $0xa] sm:$0x3] %vm796_vm3, %v1319_v17  ;;  %1879 = vmatmul.mubr.msk.f32.vlgmr.msra.gmra.mrb[6].mxu0 %vm693_vm4, %v1319_v17 }
0x133e   : > { %v1393_v19 = vpop.f32.mrb[6].mxu0 }
0x133f   : > { %v1397_v20 = vadd.f32 %v1393_v19, %v1324_v18  ;;  %v1880_v21 = vpop.f32.mrb[7].mxu0 }
0x1341   : > { %2056 = vtanh.f32 %v1397_v20  ;;  %v1719_v23 = vmul.f32 -1.442695, %v1397_v20 }
0x1343   : > { %2058 = vpow2.f32 %v1719_v23 }
0x134b   : > { %v2057_v22 = vpop.eup %2056 }
0x134c   : > { %1407 = vrot.lane.b32.xlu0 %v2057_v22, %s2173_s18 }
0x134d   : > { %v2059_v24 = vpop.eup %2058 }
0x134e   : > { %v1401_v25 = vadd.f32 1.0, %v2059_v24 }
0x1350   : > { %2060 = vrcp.f32 %v1401_v25 }
0x135a   : > { %v2061_v26 = vpop.eup %2060 }
0x135b   : > { %v1405_v29 = vmul.f32 %v2061_v26, %v1310_v13 }
0x13be   : > { %v1408_v27 = vpop.permute.xlu0 %1407 }
0x13bf   : > { %v1410_v28 = vmul.f32 %v2061_v26, %v1408_v27 }
0x13c1   : > { %1412 = vrot.lane.b32.xlu1 %v1410_v28, %s2174_s26 }
0x1433   : > { %v1413_v0 = vpop.permute.xlu1 %1412 }
0x1434   : > { %v1415_v30 = vadd.f32 %v1413_v0, %v1405_v29 }
0x1436   : > { %2062 = vtanh.f32 %v1415_v30 }
0x1440   : > { %v2063_v31 = vpop.eup %2062 }
0x1441   : > { %1418 = vrot.lane.b32.xlu0 %v2063_v31, %s2173_s18 }
0x14b3   : > { %v1419_v34 = vpop.permute.xlu0 %1418 }
0x14b4   : > { %v1421_v37 = vmul.f32 %v2061_v26, %v1419_v34 }
0x14b6   : > { %1423 = vrot.lane.b32.xlu1 %v1421_v37, %s2174_s26 }
0x1528   : > { %v1424_v38 = vpop.permute.xlu1 %1423 }
0x1529   : > { %1427 = vst.msk [vmem:[#allocation2 + $0xc] sm:$0x3] %vm796_vm3, %v1424_v38  ;;  %1890 = vmatmul.mubr.msk.f32.vlgmr.msra.gmra.mrb[6].mxu1 %vm693_vm4, %v1424_v38 }
0x15fc   : > { %v1498_v40 = vpop.f32.mrb[6].mxu1 }
0x15fd   : > { %v1502_v41 = vadd.f32 %v1498_v40, %v1429_v39  ;;  %v1891_v42 = vpop.f32.mrb[7].mxu1 }
0x15ff   : > { %2064 = vtanh.f32 %v1502_v41  ;;  %v1721_v44 = vmul.f32 -1.442695, %v1502_v41 }
0x1601   : > { %2066 = vpow2.f32 %v1721_v44 }
0x1609   : > { %v2065_v43 = vpop.eup %2064 }
0x160a   : > { %1512 = vrot.lane.b32.xlu0 %v2065_v43, %s2173_s18 }
0x160b   : > { %v2067_v45 = vpop.eup %2066 }
0x160c   : > { %v1506_v46 = vadd.f32 1.0, %v2067_v45 }
0x160e   : > { %2068 = vrcp.f32 %v1506_v46 }
0x1618   : > { %v2069_v47 = vpop.eup %2068 }
0x1619   : > { %v1510_v50 = vmul.f32 %v2069_v47, %v1415_v30 }
0x167c   : > { %v1513_v48 = vpop.permute.xlu0 %1512 }
0x167d   : > { %v1515_v49 = vmul.f32 %v2069_v47, %v1513_v48 }
0x167f   : > { %1517 = vrot.lane.b32.xlu1 %v1515_v49, %s2174_s26 }
0x16f1   : > { %v1518_v51 = vpop.permute.xlu1 %1517 }
0x16f2   : > { %v1520_v52 = vadd.f32 %v1518_v51, %v1510_v50 }
0x16f4   : > { %2070 = vtanh.f32 %v1520_v52 }
0x16fe   : > { %v2071_v53 = vpop.eup %2070 }
0x16ff   : > { %1523 = vrot.lane.b32.xlu0 %v2071_v53, %s2173_s18  ;;  %s2078_s18 = scalar_lea.vmem %s2077_s16, 64 }
0x1700   : > { %p2080_p3 = scmp.lt.s32.totalorder %s2078_s18, %s2072_s13 }
0x1702   : > { %p2081_p4 = por %p2080_p3, %p2079_p2 }
0x1703   : > { %1535 = vrot.lane.b32.xlu0 %v1520_v52, %s2175_s17 }
0x1704   : > { %p2082_p7 = pnand %p2081_p4, %p2075_p1 }
0x1771   : > { %v1524_v54 = vpop.permute.xlu0 %1523 }
0x1772   : > { %v1526_v55 = vmul.f32 %v2069_v47, %v1524_v54 }
0x1774   : > { %1528 = vrot.lane.b32.xlu1 %v1526_v55, %s2174_s26 }
0x1775   : > { %v1536_v56 = vpop.permute.xlu0 %1535 }
0x1776   : > { %1538 = vst.msk [vmem:[%s2284_s29] sm:$0x3] %vm796_vm3, %v1536_v56 }
0x1777   : > { %2085 = shalt.err (!%p2082_p7)
}
0x1778   : > { %s2086_s29 = scalar_lea.hbm %s2440_s20, 32  ;;  %s2090_s10 = scalar_lea.hbm %s2526_s6, 64 }
0x1779   : > { %p2087_p8 = scmp.ne.s32.totalorder %s2440_s20, %s2086_s29  ;;  %p2091_p11 = scmp.lt.u32.totalorder %s2440_s20, %s2526_s6 }
0x177a   : > { %p2092_p12 = scmp.lt.u32.totalorder %s2090_s10, %s2086_s29  ;;  %p2094_p0 = scmp.lt.u32.totalorder %s2086_s29, %s2440_s20 }
0x177b   : > { %p2088_p9 = pnand %p2087_p8, %p2251_p5 }
0x177c   : > { %p2093_p13 = por %p2092_p12, %p2091_p11 }
0x177d   : > { %p2089_p10 = pneg %p2088_p9 }
0x177e   : > { %p2095_p1 = por %p2094_p0, %p2093_p13 }
0x1780   : > { %p2096_p2 = pnand %p2095_p1, %p2089_p10 }
0x1782   : > { %2099 = shalt.err (!%p2096_p2)
}
0x1783   : > { %1957 = dma.vmem_to_hbm [thread:$0]  (%p2251_p5), %s2442_s15, 32, %s2440_s20, %s1545_s11  }
0x1784   : > { %s1558_s13 = sshll.u32 %s2282_s28, 4  ;;  %s2474_s26 = scalar_lea.hbm %s2525_s5, %s1724_s12  ;;  %s2476_s13 = int_to_ptr.vmem [resolvable:$true] %s1558_s13 }
0x1785   : > { %s1540_s29 = scalar_lea.sflag [#allocation5], %s2262_s9  ;;  %s2100_s17 = scalar_lea.vmem %s2476_s13, 32 }
0x1786   : > { %p2101_p3 = scmp.ne.s32.totalorder %s2476_s13, %s2100_s17  ;;  %s2177_s25 = smov [#allocation4]  }
0x1787   : > { %s2104_s15 = sshll.u32 %s2177_s25, 4  ;;  %s2105_s15 = int_to_ptr.vmem [resolvable:$false] %s2104_s15 }
0x1788   : > { %p2102_p4 = pnand %p2101_p3, %p2251_p5  ;;  %s2106_s12 = scalar_lea.vmem %s2105_s15, 64 }
0x1789   : > { %p2107_p8 = scmp.lt.s32.totalorder %s2476_s13, %s2105_s15  ;;  %p2108_p9 = scmp.lt.s32.totalorder %s2106_s12, %s2100_s17 }
0x178a   : > { %p2103_p7 = pneg %p2102_p4 }
0x178b   : > { %p2109_p10 = por %p2108_p9, %p2107_p8 }
0x178d   : > { %p2110_p11 = pnand %p2109_p10, %p2103_p7 }
0x17e6   : > { %v1529_v57 = vpop.permute.xlu1 %1528 }
0x17e7   : > { %1532 = vst.msk [vmem:[#allocation2 + $0xe] sm:$0x3] %vm796_vm3, %v1529_v57  ;;  %1533 = vst.msk [vmem:[%s2282_s28] sm:$0x3] %vm796_vm3, %v1529_v57 }
0x17e8   : > { %2113 = shalt.err (!%p2110_p11)
}
0x17e9   : > { %s2114_s9 = scalar_lea.hbm %s2474_s26, 32  ;;  %s2118_s11 = scalar_lea.hbm %s2525_s5, 64 }
0x17ea   : > { %p2115_p12 = scmp.ne.s32.totalorder %s2474_s26, %s2114_s9  ;;  %p2119_p1 = scmp.lt.u32.totalorder %s2474_s26, %s2525_s5 }
0x17eb   : > { %p2120_p2 = scmp.lt.u32.totalorder %s2118_s11, %s2114_s9  ;;  %p2122_p4 = scmp.lt.u32.totalorder %s2114_s9, %s2474_s26 }
0x17ec   : > { %p2116_p13 = pnand %p2115_p12, %p2251_p5 }
0x17ed   : > { %p2121_p3 = por %p2120_p2, %p2119_p1 }
0x17ee   : > { %p2117_p0 = pneg %p2116_p13 }
0x17ef   : > { %p2123_p7 = por %p2122_p4, %p2121_p3 }
0x17f1   : > { %p2124_p8 = pnand %p2123_p7, %p2117_p0 }
0x17f3   : > { %2127 = shalt.err (!%p2124_p8)
}
0x17f4   : > { %1956 = dma.vmem_to_hbm [thread:$0]  (%p2251_p5), %s2476_s13, 32, %s2474_s26, %s1540_s29  }
0x17f5 PF: > { %p1967_p9 = scmp.ge.s32.totalorder %s2166_s24, 2  ;;  %s1583_s14 = sand.u32 1, %s2154_s21  }
0x17f6   : > { %s1584_s16 = scalar_lea.sflag [#allocation5], %s1583_s14 }
0x17f7   : > { %p1961_p10 = pnand %p1967_p9, %p2255_p6 }
0x17f9   : > { %2145 = dma.done.wait (!%p1961_p10), %s1584_s16, 32  }
0x17fa   : > { %2147 = vsyncadd (!%p1961_p10), %s1584_s16, 4294967264  ;;  %s1593_s18 = scalar_lea.sflag [#allocation7], %s1583_s14 }
0x17fb   : > { %2149 = dma.done.wait (!%p1961_p10), %s1593_s18, 32  }
0x17fc   : > { %2151 = vsyncadd (!%p1961_p10), %s1593_s18, 4294967264  ;;  %p20_p5 = scmp.ge.s32.totalorder %s2238_s27, 4   ;;  %s2529_s21 = smov %s2158_s22 }
0x17fd   : > { %s2530_s22 = smov %s2162_s23  ;;  %s2531_s23 = smov %s2249_s30 }
0x17fe   : > { %s2532_s24 = smov %s2238_s27  ;;  %22 = sbr.rel (!%p20_p5) target bundleno = 5 (0x5), region = 120 }
0x1805   :  { %1598 = vsyncpa [#allocation5], 1 }
0x1806   :  { %1600 = vsyncpa [#allocation5 + $0x1], 1 }
0x1807   :  { %1601 = vsyncpa [#allocation7], 1 }
0x1808   :  { %1603 = vsyncpa [#allocation7 + $0x1], 1 }

</bundles_post_ra>
